<compile_context>
chip_gen: v7x
topology: tpu7x:2x2x1
jax: 0.10.0
libtpu: 0.0.40
codegen_flags: <defaults>
</compile_context>

<pallas_src>
import functools

import jax
import jax.numpy as jnp
from jax.experimental import pallas as pl
from jax.experimental.pallas import tpu as pltpu


def _round_up(x, m):
    return ((x + m - 1) // m) * m


# --------------------------------------------------------------------------
# Fused-parameter preparation (done once per model, not per step)
# --------------------------------------------------------------------------
def prepare_fused_params(params, *, embedding_size, hidden_size, num_layers):
    E, H, L = embedding_size, hidden_size, num_layers
    E_pad = _round_up(E, 128)
    H_pad = _round_up(H, 128)
    IN_pad = max(E_pad, H_pad)

    V = params["embedding"].shape[0]
    V_pad = _round_up(V, 8)
    emb_pad = jnp.zeros((V_pad, E_pad), jnp.float32)
    emb_pad = emb_pad.at[:V, :E].set(params["embedding"].astype(jnp.float32))

    Ws, Bs = [], []
    for l, p in enumerate(params["gru"]):
        I = E if l == 0 else H
        wih = p["w_ih_t"].astype(jnp.float32)      # [I, 3H]  (cols: r | z | n)
        whh = p["w_hh_t"].astype(jnp.float32)      # [H, 3H]
        bih = p["b_ih"][0].astype(jnp.float32)     # [3H]
        bhh = p["b_hh"][0].astype(jnp.float32)     # [3H]

        # Fused weight: rows = [x (IN_pad) | h (H_pad)], cols = (r | z | i_n | h_n), padded.
        W = jnp.zeros((IN_pad + H_pad, 4 * H_pad), jnp.float32)
        W = W.at[:I, 0:H].set(wih[:, 0:H])                                   # r  (from x)
        W = W.at[IN_pad:IN_pad + H, 0:H].set(whh[:, 0:H])                    # r  (from h)
        W = W.at[:I, H_pad:H_pad + H].set(wih[:, H:2 * H])                   # z  (from x)
        W = W.at[IN_pad:IN_pad + H, H_pad:H_pad + H].set(whh[:, H:2 * H])    # z  (from h)
        W = W.at[:I, 2 * H_pad:2 * H_pad + H].set(wih[:, 2 * H:3 * H])       # i_n (x only)
        W = W.at[IN_pad:IN_pad + H, 3 * H_pad:3 * H_pad + H].set(whh[:, 2 * H:3 * H])  # h_n

        b = jnp.zeros((1, 4 * H_pad), jnp.float32)
        b = b.at[0, 0:H].set(bih[0:H] + bhh[0:H])                            # r bias (folded)
        b = b.at[0, H_pad:H_pad + H].set(bih[H:2 * H] + bhh[H:2 * H])        # z bias (folded)
        b = b.at[0, 2 * H_pad:2 * H_pad + H].set(bih[2 * H:3 * H])           # b_in
        b = b.at[0, 3 * H_pad:3 * H_pad + H].set(bhh[2 * H:3 * H])           # b_hn

        Ws.append(W)
        Bs.append(b)

    return {"emb": emb_pad, "W": Ws, "b": Bs}


# --------------------------------------------------------------------------
# Fused single-step kernel (embedding gather + L GRU layers in one pallas_call)
# --------------------------------------------------------------------------
def _encoder_step_impl(tokens, hidden, emb_pad, Ws, bs):
    L, B, H = hidden.shape
    E_pad = emb_pad.shape[1]
    H_pad = bs[0].shape[1] // 4
    IN_pad = Ws[0].shape[0] - H_pad
    B_pad = _round_up(B, 8)

    tokens = tokens.astype(jnp.int32)
    hidden_pad = jnp.zeros((L, B_pad, H_pad), jnp.float32)
    hidden_pad = hidden_pad.at[:, :B, :H].set(hidden.astype(jnp.float32))

    def kernel(tok_ref, emb_ref, h_in_ref, *rest):
        w_refs = rest[:L]
        b_refs = rest[L:2 * L]
        h_out_ref = rest[2 * L]
        xh_ref = rest[2 * L + 1]           # VMEM scratch: [B_pad, IN_pad + H_pad]
        sems = rest[2 * L + 2]             # DMA semaphores, one per batch row

        # ---- embedding gather: one small DMA per batch row; table stays in HBM ----
        copies = []
        for row in range(B):
            tok = tok_ref[row]                                     # scalar i32 from SMEM
            cp = pltpu.make_async_copy(
                emb_ref.at[pl.ds(tok, 1), :],                      # [1, E_pad] row in HBM
                xh_ref.at[pl.ds(row, 1), pl.ds(0, E_pad)],         # x-region of scratch
                sems.at[row])
            cp.start()
            copies.append(cp)

        # Zero the padded batch rows while the gather DMAs are in flight (disjoint region).
        if B_pad > B:
            xh_ref[pl.ds(B, B_pad - B), :] = jnp.zeros(
                (B_pad - B, IN_pad + H_pad), jnp.float32)

        for cp in copies:
            cp.wait()

        # ---- unrolled GRU stack: x and h never leave VMEM between layers ----
        for l in range(L):
            h = h_in_ref[l]                                        # [B_pad, H_pad]
            xh_ref[:, pl.ds(IN_pad, H_pad)] = h
            # One fused MXU matmul per layer: [x | h] @ (r | z | i_n | h_n).
            g = jnp.dot(xh_ref[...], w_refs[l][...],
                        preferred_element_type=jnp.float32) + b_refs[l][...]
            r = jax.nn.sigmoid(g[:, 0:H_pad])
            z = jax.nn.sigmoid(g[:, H_pad:2 * H_pad])
            n = jnp.tanh(g[:, 2 * H_pad:3 * H_pad] + r * g[:, 3 * H_pad:4 * H_pad])
            h_new = (1.0 - z) * n + z * h
            h_out_ref[l] = h_new
            if l + 1 < L:                                          # feed next layer's x
                xh_ref[:, pl.ds(0, H_pad)] = h_new

    vmem = pl.BlockSpec(memory_space=pltpu.MemorySpace.VMEM)
    smem = pl.BlockSpec(memory_space=pltpu.MemorySpace.SMEM)
    anyspace = pl.BlockSpec(memory_space=pl.ANY)

    hidden_new_pad = pl.pallas_call(
        kernel,
        out_shape=jax.ShapeDtypeStruct((L, B_pad, H_pad), jnp.float32),
        in_specs=[smem, anyspace, vmem] + [vmem] * (2 * L),
        out_specs=vmem,
        scratch_shapes=[
            pltpu.VMEM((B_pad, IN_pad + H_pad), jnp.float32),      # [x | h] operand buffer
            pltpu.SemaphoreType.DMA((B,)),
        ],
        input_output_aliases={2: 0},                               # hidden_pad -> new hidden
    )(tokens, emb_pad, hidden_pad, *Ws, *bs)

    hidden_new = hidden_new_pad[:, :B, :H]
    output = hidden_new[L - 1][None]                               # [1, B, H]
    return output, hidden_new


_encoder_step = jax.jit(_encoder_step_impl)


def encoder_rnn_forward(fused_params, input_tensor, hidden):
    """Mirrors EncoderRNN.forward: returns (output [1,B,H], hidden [L,B,H])."""
    return _encoder_step(input_tensor, hidden, fused_params["emb"],
                         tuple(fused_params["W"]), tuple(fused_params["b"]))


# --------------------------------------------------------------------------
# Deterministic parameter init (same shapes/convention as nn.Embedding / nn.GRU)
# --------------------------------------------------------------------------
def init_params(key, *, input_size, embedding_size, hidden_size, num_hidden_layers):
    keys = jax.random.split(key, 1 + 4 * num_hidden_layers)
    params = {"embedding": jax.random.normal(keys[0], (input_size, embedding_size),
                                             dtype=jnp.float32)}
    bound = 1.0 / jnp.sqrt(hidden_size)
    gru = []
    for l in range(num_hidden_layers):
        in_dim = embedding_size if l == 0 else hidden_size
        k_wih, k_whh, k_bih, k_bhh = keys[1 + 4 * l: 1 + 4 * (l + 1)]
        # PyTorch stores weight_ih_l{l}: [3H, in_dim]; we keep the transpose [in_dim, 3H].
        gru.append({
            "w_ih_t": jax.random.uniform(k_wih, (in_dim, 3 * hidden_size),
                                         minval=-bound, maxval=bound, dtype=jnp.float32),
            "w_hh_t": jax.random.uniform(k_whh, (hidden_size, 3 * hidden_size),
                                         minval=-bound, maxval=bound, dtype=jnp.float32),
            "b_ih": jax.random.uniform(k_bih, (1, 3 * hidden_size),
                                       minval=-bound, maxval=bound, dtype=jnp.float32),
            "b_hh": jax.random.uniform(k_bhh, (1, 3 * hidden_size),
                                       minval=-bound, maxval=bound, dtype=jnp.float32),
        })
    params["gru"] = gru
    return params


# --------------------------------------------------------------------------
# Pure-JAX reference (same math) for a correctness check
# --------------------------------------------------------------------------
def reference_forward(params, input_tensor, hidden):
    x = jnp.take(params["embedding"], input_tensor, axis=0)
    new_hidden = []
    for l, p in enumerate(params["gru"]):
        h = hidden[l]
        gi = x @ p["w_ih_t"] + p["b_ih"]
        gh = h @ p["w_hh_t"] + p["b_hh"]
        H = h.shape[1]
        r = jax.nn.sigmoid(gi[:, :H] + gh[:, :H])
        z = jax.nn.sigmoid(gi[:, H:2 * H] + gh[:, H:2 * H])
        n = jnp.tanh(gi[:, 2 * H:] + r * gh[:, 2 * H:])
        h_new = (1.0 - z) * n + z * h
        new_hidden.append(h_new)
        x = h_new
    return x[None], jnp.stack(new_hidden, axis=0)


if __name__ == "__main__":
    INPUT_SIZE = 20       # vocab
    EMBEDDING_SIZE = 16
    HIDDEN_SIZE = 32
    NUM_LAYERS = 2
    BATCH = 4

    key = jax.random.PRNGKey(0)
    k_params, k_tok = jax.random.split(key)

    params = init_params(k_params, input_size=INPUT_SIZE, embedding_size=EMBEDDING_SIZE,
                         hidden_size=HIDDEN_SIZE, num_hidden_layers=NUM_LAYERS)
    fused = prepare_fused_params(params, embedding_size=EMBEDDING_SIZE,
                                 hidden_size=HIDDEN_SIZE, num_layers=NUM_LAYERS)

    input_tensor = jax.random.randint(k_tok, (BATCH,), 0, INPUT_SIZE, dtype=jnp.int32)
    hidden0 = jnp.zeros((NUM_LAYERS, BATCH, HIDDEN_SIZE), dtype=jnp.float32)  # init_hidden

    output, hidden = encoder_rnn_forward(fused, input_tensor, hidden0)
    output = jax.block_until_ready(output)
    hidden = jax.block_until_ready(hidden)

    ref_out, ref_hid = reference_forward(params, input_tensor, hidden0)
    assert output.shape == (1, BATCH, HIDDEN_SIZE)
    assert hidden.shape == (NUM_LAYERS, BATCH, HIDDEN_SIZE)
    assert jnp.allclose(output, ref_out, atol=1e-4, rtol=1e-4)
    assert jnp.allclose(hidden, ref_hid, atol=1e-4, rtol=1e-4)

    print("KERNEL_OK")
</pallas_src>

<mosaic_0001>
module attributes {stable_mosaic.version = 11 : i64} {
  func.func @kernel(%arg0: memref<4xi32, #tpu.memory_space<smem>>, %arg1: memref<24x128xf32, #tpu.memory_space<any>>, %arg2: memref<2x8x128xf32, #tpu.memory_space<vmem>>, %arg3: memref<256x512xf32, #tpu.memory_space<vmem>>, %arg4: memref<256x512xf32, #tpu.memory_space<vmem>>, %arg5: memref<1x512xf32, #tpu.memory_space<vmem>>, %arg6: memref<1x512xf32, #tpu.memory_space<vmem>>, %arg7: memref<2x8x128xf32, #tpu.memory_space<vmem>>, %arg8: memref<8x256xf32, #tpu.memory_space<vmem>>, %arg9: memref<4x!tpu.dma_semaphore, #tpu.memory_space<semaphore_mem>>) attributes {dimension_semantics = [], scalar_prefetch = 0 : i64, scratch_operands = 2 : i64, tpu.core_type = #tpu.core_type<tc>} {
    %c0 = arith.constant 0 : index
    %0 = memref.load %arg0[%c0] : memref<4xi32, #tpu.memory_space<smem>>
    %c0_i32 = arith.constant 0 : i32
    %c0_i32_0 = arith.constant 0 : i32
    %1 = tpu.memref_slice %arg1[%0, %c0_i32_0] : memref<24x128xf32, #tpu.memory_space<any>> -> memref<1x128xf32, #tpu.memory_space<any>>
    %c0_i32_1 = arith.constant 0 : i32
    %c0_i32_2 = arith.constant 0 : i32
    %2 = tpu.memref_slice %arg8[%c0_i32_1, %c0_i32_2] : memref<8x256xf32, #tpu.memory_space<vmem>> -> memref<1x128xf32, #tpu.memory_space<vmem>>
    %3 = tpu.memref_slice %arg9[%c0_i32] : memref<4x!tpu.dma_semaphore, #tpu.memory_space<semaphore_mem>> -> memref<1x!tpu.dma_semaphore, #tpu.memory_space<semaphore_mem>>
    %4 = tpu.memref_squeeze %3 : memref<1x!tpu.dma_semaphore, #tpu.memory_space<semaphore_mem>> -> memref<!tpu.dma_semaphore, #tpu.memory_space<semaphore_mem>>
    tpu.enqueue_dma source(%1 : memref<1x128xf32, #tpu.memory_space<any>>) target(%2 : memref<1x128xf32, #tpu.memory_space<vmem>>) target_semaphore(%4 : memref<!tpu.dma_semaphore, #tpu.memory_space<semaphore_mem>>)
    %c1 = arith.constant 1 : index
    %5 = memref.load %arg0[%c1] : memref<4xi32, #tpu.memory_space<smem>>
    %c1_i32 = arith.constant 1 : i32
    %c0_i32_3 = arith.constant 0 : i32
    %6 = tpu.memref_slice %arg1[%5, %c0_i32_3] : memref<24x128xf32, #tpu.memory_space<any>> -> memref<1x128xf32, #tpu.memory_space<any>>
    %c1_i32_4 = arith.constant 1 : i32
    %c0_i32_5 = arith.constant 0 : i32
    %7 = tpu.memref_slice %arg8[%c1_i32_4, %c0_i32_5] : memref<8x256xf32, #tpu.memory_space<vmem>> -> memref<1x128xf32, #tpu.memory_space<vmem>>
    %8 = tpu.memref_slice %arg9[%c1_i32] : memref<4x!tpu.dma_semaphore, #tpu.memory_space<semaphore_mem>> -> memref<1x!tpu.dma_semaphore, #tpu.memory_space<semaphore_mem>>
    %9 = tpu.memref_squeeze %8 : memref<1x!tpu.dma_semaphore, #tpu.memory_space<semaphore_mem>> -> memref<!tpu.dma_semaphore, #tpu.memory_space<semaphore_mem>>
    tpu.enqueue_dma source(%6 : memref<1x128xf32, #tpu.memory_space<any>>) target(%7 : memref<1x128xf32, #tpu.memory_space<vmem>>) target_semaphore(%9 : memref<!tpu.dma_semaphore, #tpu.memory_space<semaphore_mem>>)
    %c2 = arith.constant 2 : index
    %10 = memref.load %arg0[%c2] : memref<4xi32, #tpu.memory_space<smem>>
    %c2_i32 = arith.constant 2 : i32
    %c0_i32_6 = arith.constant 0 : i32
    %11 = tpu.memref_slice %arg1[%10, %c0_i32_6] : memref<24x128xf32, #tpu.memory_space<any>> -> memref<1x128xf32, #tpu.memory_space<any>>
    %c2_i32_7 = arith.constant 2 : i32
    %c0_i32_8 = arith.constant 0 : i32
    %12 = tpu.memref_slice %arg8[%c2_i32_7, %c0_i32_8] : memref<8x256xf32, #tpu.memory_space<vmem>> -> memref<1x128xf32, #tpu.memory_space<vmem>>
    %13 = tpu.memref_slice %arg9[%c2_i32] : memref<4x!tpu.dma_semaphore, #tpu.memory_space<semaphore_mem>> -> memref<1x!tpu.dma_semaphore, #tpu.memory_space<semaphore_mem>>
    %14 = tpu.memref_squeeze %13 : memref<1x!tpu.dma_semaphore, #tpu.memory_space<semaphore_mem>> -> memref<!tpu.dma_semaphore, #tpu.memory_space<semaphore_mem>>
    tpu.enqueue_dma source(%11 : memref<1x128xf32, #tpu.memory_space<any>>) target(%12 : memref<1x128xf32, #tpu.memory_space<vmem>>) target_semaphore(%14 : memref<!tpu.dma_semaphore, #tpu.memory_space<semaphore_mem>>)
    %c3 = arith.constant 3 : index
    %15 = memref.load %arg0[%c3] : memref<4xi32, #tpu.memory_space<smem>>
    %c3_i32 = arith.constant 3 : i32
    %c0_i32_9 = arith.constant 0 : i32
    %16 = tpu.memref_slice %arg1[%15, %c0_i32_9] : memref<24x128xf32, #tpu.memory_space<any>> -> memref<1x128xf32, #tpu.memory_space<any>>
    %c3_i32_10 = arith.constant 3 : i32
    %c0_i32_11 = arith.constant 0 : i32
    %17 = tpu.memref_slice %arg8[%c3_i32_10, %c0_i32_11] : memref<8x256xf32, #tpu.memory_space<vmem>> -> memref<1x128xf32, #tpu.memory_space<vmem>>
    %18 = tpu.memref_slice %arg9[%c3_i32] : memref<4x!tpu.dma_semaphore, #tpu.memory_space<semaphore_mem>> -> memref<1x!tpu.dma_semaphore, #tpu.memory_space<semaphore_mem>>
    %19 = tpu.memref_squeeze %18 : memref<1x!tpu.dma_semaphore, #tpu.memory_space<semaphore_mem>> -> memref<!tpu.dma_semaphore, #tpu.memory_space<semaphore_mem>>
    tpu.enqueue_dma source(%16 : memref<1x128xf32, #tpu.memory_space<any>>) target(%17 : memref<1x128xf32, #tpu.memory_space<vmem>>) target_semaphore(%19 : memref<!tpu.dma_semaphore, #tpu.memory_space<semaphore_mem>>)
    %cst = arith.constant 0.000000e+00 : f32
    %20 = vector.broadcast %cst : f32 to vector<4x256xf32>
    %c4 = arith.constant 4 : index
    %c0_12 = arith.constant 0 : index
    %21 = vector.load %arg8[%c4, %c0_12] : memref<8x256xf32, #tpu.memory_space<vmem>>, vector<4x256xf32>
    tpu.vector_store %arg8[%c4, %c0_12], %20 {strides = array<i32>} : memref<8x256xf32, #tpu.memory_space<vmem>>, vector<4x256xf32>,
    %c0_i32_13 = arith.constant 0 : i32
    %c0_i32_14 = arith.constant 0 : i32
    %22 = tpu.memref_slice %arg1[%0, %c0_i32_14] : memref<24x128xf32, #tpu.memory_space<any>> -> memref<1x128xf32, #tpu.memory_space<any>>
    %c0_i32_15 = arith.constant 0 : i32
    %c0_i32_16 = arith.constant 0 : i32
    %23 = tpu.memref_slice %arg8[%c0_i32_15, %c0_i32_16] : memref<8x256xf32, #tpu.memory_space<vmem>> -> memref<1x128xf32, #tpu.memory_space<vmem>>
    %24 = tpu.memref_slice %arg9[%c0_i32_13] : memref<4x!tpu.dma_semaphore, #tpu.memory_space<semaphore_mem>> -> memref<1x!tpu.dma_semaphore, #tpu.memory_space<semaphore_mem>>
    %25 = tpu.memref_squeeze %24 : memref<1x!tpu.dma_semaphore, #tpu.memory_space<semaphore_mem>> -> memref<!tpu.dma_semaphore, #tpu.memory_space<semaphore_mem>>
    tpu.wait_dma2 semaphore(%25 : memref<!tpu.dma_semaphore, #tpu.memory_space<semaphore_mem>>) src(%22 : memref<1x128xf32, #tpu.memory_space<any>>) dst(%23 : memref<1x128xf32, #tpu.memory_space<vmem>>)
    %c1_i32_17 = arith.constant 1 : i32
    %c0_i32_18 = arith.constant 0 : i32
    %26 = tpu.memref_slice %arg1[%5, %c0_i32_18] : memref<24x128xf32, #tpu.memory_space<any>> -> memref<1x128xf32, #tpu.memory_space<any>>
    %c1_i32_19 = arith.constant 1 : i32
    %c0_i32_20 = arith.constant 0 : i32
    %27 = tpu.memref_slice %arg8[%c1_i32_19, %c0_i32_20] : memref<8x256xf32, #tpu.memory_space<vmem>> -> memref<1x128xf32, #tpu.memory_space<vmem>>
    %28 = tpu.memref_slice %arg9[%c1_i32_17] : memref<4x!tpu.dma_semaphore, #tpu.memory_space<semaphore_mem>> -> memref<1x!tpu.dma_semaphore, #tpu.memory_space<semaphore_mem>>
    %29 = tpu.memref_squeeze %28 : memref<1x!tpu.dma_semaphore, #tpu.memory_space<semaphore_mem>> -> memref<!tpu.dma_semaphore, #tpu.memory_space<semaphore_mem>>
    tpu.wait_dma2 semaphore(%29 : memref<!tpu.dma_semaphore, #tpu.memory_space<semaphore_mem>>) src(%26 : memref<1x128xf32, #tpu.memory_space<any>>) dst(%27 : memref<1x128xf32, #tpu.memory_space<vmem>>)
    %c2_i32_21 = arith.constant 2 : i32
    %c0_i32_22 = arith.constant 0 : i32
    %30 = tpu.memref_slice %arg1[%10, %c0_i32_22] : memref<24x128xf32, #tpu.memory_space<any>> -> memref<1x128xf32, #tpu.memory_space<any>>
    %c2_i32_23 = arith.constant 2 : i32
    %c0_i32_24 = arith.constant 0 : i32
    %31 = tpu.memref_slice %arg8[%c2_i32_23, %c0_i32_24] : memref<8x256xf32, #tpu.memory_space<vmem>> -> memref<1x128xf32, #tpu.memory_space<vmem>>
    %32 = tpu.memref_slice %arg9[%c2_i32_21] : memref<4x!tpu.dma_semaphore, #tpu.memory_space<semaphore_mem>> -> memref<1x!tpu.dma_semaphore, #tpu.memory_space<semaphore_mem>>
    %33 = tpu.memref_squeeze %32 : memref<1x!tpu.dma_semaphore, #tpu.memory_space<semaphore_mem>> -> memref<!tpu.dma_semaphore, #tpu.memory_space<semaphore_mem>>
    tpu.wait_dma2 semaphore(%33 : memref<!tpu.dma_semaphore, #tpu.memory_space<semaphore_mem>>) src(%30 : memref<1x128xf32, #tpu.memory_space<any>>) dst(%31 : memref<1x128xf32, #tpu.memory_space<vmem>>)
    %c3_i32_25 = arith.constant 3 : i32
    %c0_i32_26 = arith.constant 0 : i32
    %34 = tpu.memref_slice %arg1[%15, %c0_i32_26] : memref<24x128xf32, #tpu.memory_space<any>> -> memref<1x128xf32, #tpu.memory_space<any>>
    %c3_i32_27 = arith.constant 3 : i32
    %c0_i32_28 = arith.constant 0 : i32
    %35 = tpu.memref_slice %arg8[%c3_i32_27, %c0_i32_28] : memref<8x256xf32, #tpu.memory_space<vmem>> -> memref<1x128xf32, #tpu.memory_space<vmem>>
    %36 = tpu.memref_slice %arg9[%c3_i32_25] : memref<4x!tpu.dma_semaphore, #tpu.memory_space<semaphore_mem>> -> memref<1x!tpu.dma_semaphore, #tpu.memory_space<semaphore_mem>>
    %37 = tpu.memref_squeeze %36 : memref<1x!tpu.dma_semaphore, #tpu.memory_space<semaphore_mem>> -> memref<!tpu.dma_semaphore, #tpu.memory_space<semaphore_mem>>
    tpu.wait_dma2 semaphore(%37 : memref<!tpu.dma_semaphore, #tpu.memory_space<semaphore_mem>>) src(%34 : memref<1x128xf32, #tpu.memory_space<any>>) dst(%35 : memref<1x128xf32, #tpu.memory_space<vmem>>)
    %c0_29 = arith.constant 0 : index
    %c0_30 = arith.constant 0 : index
    %c0_31 = arith.constant 0 : index
    %38 = vector.load %arg2[%c0_29, %c0_30, %c0_31] : memref<2x8x128xf32, #tpu.memory_space<vmem>>, vector<1x8x128xf32>
    %39 = vector.shape_cast %38 : vector<1x8x128xf32> to vector<8x128xf32>
    %c0_32 = arith.constant 0 : index
    %c128 = arith.constant 128 : index
    %40 = vector.load %arg8[%c0_32, %c128] : memref<8x256xf32, #tpu.memory_space<vmem>>, vector<8x128xf32>
    tpu.vector_store %arg8[%c0_32, %c128], %39 {strides = array<i32>} : memref<8x256xf32, #tpu.memory_space<vmem>>, vector<8x128xf32>,
    %c0_33 = arith.constant 0 : index
    %c0_34 = arith.constant 0 : index
    %41 = vector.load %arg8[%c0_33, %c0_34] : memref<8x256xf32, #tpu.memory_space<vmem>>, vector<8x256xf32>
    %c0_35 = arith.constant 0 : index
    %c0_36 = arith.constant 0 : index
    %42 = vector.load %arg3[%c0_35, %c0_36] : memref<256x512xf32, #tpu.memory_space<vmem>>, vector<256x512xf32>
    %cst_37 = arith.constant dense<0.000000e+00> : vector<8x512xf32>
    %43 = tpu.matmul %41, %42, %cst_37 {dimension_numbers = #tpu.dot_dimension_numbers<[1], [0], [0], [1], [0, 0, 1, 1], [], []>} : vector<8x256xf32>, vector<256x512xf32>, vector<8x512xf32> -> vector<8x512xf32>
    %c0_38 = arith.constant 0 : index
    %c0_39 = arith.constant 0 : index
    %44 = vector.load %arg5[%c0_38, %c0_39] : memref<1x512xf32, #tpu.memory_space<vmem>>, vector<1x512xf32>
    %45 = vector.broadcast %44 : vector<1x512xf32> to vector<8x512xf32>
    %46 = arith.addf %43, %45 : vector<8x512xf32>
    %47 = vector.extract_strided_slice %46 {offsets = [0, 0], sizes = [8, 128], strides = [1, 1]} : vector<8x512xf32> to vector<8x128xf32>
    %48 = arith.negf %47 : vector<8x128xf32>
    %49 = math.exp %48 : vector<8x128xf32>
    %cst_40 = arith.constant 1.000000e+00 : f32
    %50 = vector.broadcast %cst_40 : f32 to vector<8x128xf32>
    %51 = arith.addf %50, %49 : vector<8x128xf32>
    %52 = arith.divf %50, %51 : vector<8x128xf32>
    %53 = vector.extract_strided_slice %46 {offsets = [0, 128], sizes = [8, 128], strides = [1, 1]} : vector<8x512xf32> to vector<8x128xf32>
    %54 = arith.negf %53 : vector<8x128xf32>
    %55 = math.exp %54 : vector<8x128xf32>
    %cst_41 = arith.constant 1.000000e+00 : f32
    %56 = vector.broadcast %cst_41 : f32 to vector<8x128xf32>
    %57 = arith.addf %56, %55 : vector<8x128xf32>
    %58 = arith.divf %56, %57 : vector<8x128xf32>
    %59 = vector.extract_strided_slice %46 {offsets = [0, 256], sizes = [8, 128], strides = [1, 1]} : vector<8x512xf32> to vector<8x128xf32>
    %60 = vector.extract_strided_slice %46 {offsets = [0, 384], sizes = [8, 128], strides = [1, 1]} : vector<8x512xf32> to vector<8x128xf32>
    %61 = arith.mulf %52, %60 : vector<8x128xf32>
    %62 = arith.addf %59, %61 : vector<8x128xf32>
    %63 = math.tanh %62 : vector<8x128xf32>
    %cst_42 = arith.constant 1.000000e+00 : f32
    %64 = vector.broadcast %cst_42 : f32 to vector<8x128xf32>
    %65 = arith.subf %64, %58 : vector<8x128xf32>
    %66 = arith.mulf %65, %63 : vector<8x128xf32>
    %67 = arith.mulf %58, %39 : vector<8x128xf32>
    %68 = arith.addf %66, %67 : vector<8x128xf32>
    %c0_43 = arith.constant 0 : index
    %c0_44 = arith.constant 0 : index
    %c0_45 = arith.constant 0 : index
    %69 = vector.load %arg7[%c0_43, %c0_44, %c0_45] : memref<2x8x128xf32, #tpu.memory_space<vmem>>, vector<1x8x128xf32>
    %70 = vector.shape_cast %69 : vector<1x8x128xf32> to vector<8x128xf32>
    %71 = vector.shape_cast %68 : vector<8x128xf32> to vector<1x8x128xf32>
    tpu.vector_store %arg7[%c0_43, %c0_44, %c0_45], %71 {strides = array<i32>} : memref<2x8x128xf32, #tpu.memory_space<vmem>>, vector<1x8x128xf32>,
    %c0_46 = arith.constant 0 : index
    %c0_47 = arith.constant 0 : index
    %72 = vector.load %arg8[%c0_46, %c0_47] : memref<8x256xf32, #tpu.memory_space<vmem>>, vector<8x128xf32>
    tpu.vector_store %arg8[%c0_46, %c0_47], %68 {strides = array<i32>} : memref<8x256xf32, #tpu.memory_space<vmem>>, vector<8x128xf32>,
    %c1_48 = arith.constant 1 : index
    %c0_49 = arith.constant 0 : index
    %c0_50 = arith.constant 0 : index
    %73 = vector.load %arg2[%c1_48, %c0_49, %c0_50] : memref<2x8x128xf32, #tpu.memory_space<vmem>>, vector<1x8x128xf32>
    %74 = vector.shape_cast %73 : vector<1x8x128xf32> to vector<8x128xf32>
    %c0_51 = arith.constant 0 : index
    %c128_52 = arith.constant 128 : index
    %75 = vector.load %arg8[%c0_51, %c128_52] : memref<8x256xf32, #tpu.memory_space<vmem>>, vector<8x128xf32>
    tpu.vector_store %arg8[%c0_51, %c128_52], %74 {strides = array<i32>} : memref<8x256xf32, #tpu.memory_space<vmem>>, vector<8x128xf32>,
    %c0_53 = arith.constant 0 : index
    %c0_54 = arith.constant 0 : index
    %76 = vector.load %arg8[%c0_53, %c0_54] : memref<8x256xf32, #tpu.memory_space<vmem>>, vector<8x256xf32>
    %c0_55 = arith.constant 0 : index
    %c0_56 = arith.constant 0 : index
    %77 = vector.load %arg4[%c0_55, %c0_56] : memref<256x512xf32, #tpu.memory_space<vmem>>, vector<256x512xf32>
    %cst_57 = arith.constant dense<0.000000e+00> : vector<8x512xf32>
    %78 = tpu.matmul %76, %77, %cst_57 {dimension_numbers = #tpu.dot_dimension_numbers<[1], [0], [0], [1], [0, 0, 1, 1], [], []>} : vector<8x256xf32>, vector<256x512xf32>, vector<8x512xf32> -> vector<8x512xf32>
    %c0_58 = arith.constant 0 : index
    %c0_59 = arith.constant 0 : index
    %79 = vector.load %arg6[%c0_58, %c0_59] : memref<1x512xf32, #tpu.memory_space<vmem>>, vector<1x512xf32>
    %80 = vector.broadcast %79 : vector<1x512xf32> to vector<8x512xf32>
    %81 = arith.addf %78, %80 : vector<8x512xf32>
    %82 = vector.extract_strided_slice %81 {offsets = [0, 0], sizes = [8, 128], strides = [1, 1]} : vector<8x512xf32> to vector<8x128xf32>
    %83 = arith.negf %82 : vector<8x128xf32>
    %84 = math.exp %83 : vector<8x128xf32>
    %cst_60 = arith.constant 1.000000e+00 : f32
    %85 = vector.broadcast %cst_60 : f32 to vector<8x128xf32>
    %86 = arith.addf %85, %84 : vector<8x128xf32>
    %87 = arith.divf %85, %86 : vector<8x128xf32>
    %88 = vector.extract_strided_slice %81 {offsets = [0, 128], sizes = [8, 128], strides = [1, 1]} : vector<8x512xf32> to vector<8x128xf32>
    %89 = arith.negf %88 : vector<8x128xf32>
    %90 = math.exp %89 : vector<8x128xf32>
    %cst_61 = arith.constant 1.000000e+00 : f32
    %91 = vector.broadcast %cst_61 : f32 to vector<8x128xf32>
    %92 = arith.addf %91, %90 : vector<8x128xf32>
    %93 = arith.divf %91, %92 : vector<8x128xf32>
    %94 = vector.extract_strided_slice %81 {offsets = [0, 256], sizes = [8, 128], strides = [1, 1]} : vector<8x512xf32> to vector<8x128xf32>
    %95 = vector.extract_strided_slice %81 {offsets = [0, 384], sizes = [8, 128], strides = [1, 1]} : vector<8x512xf32> to vector<8x128xf32>
    %96 = arith.mulf %87, %95 : vector<8x128xf32>
    %97 = arith.addf %94, %96 : vector<8x128xf32>
    %98 = math.tanh %97 : vector<8x128xf32>
    %cst_62 = arith.constant 1.000000e+00 : f32
    %99 = vector.broadcast %cst_62 : f32 to vector<8x128xf32>
    %100 = arith.subf %99, %93 : vector<8x128xf32>
    %101 = arith.mulf %100, %98 : vector<8x128xf32>
    %102 = arith.mulf %93, %74 : vector<8x128xf32>
    %103 = arith.addf %101, %102 : vector<8x128xf32>
    %c1_63 = arith.constant 1 : index
    %c0_64 = arith.constant 0 : index
    %c0_65 = arith.constant 0 : index
    %104 = vector.load %arg7[%c1_63, %c0_64, %c0_65] : memref<2x8x128xf32, #tpu.memory_space<vmem>>, vector<1x8x128xf32>
    %105 = vector.shape_cast %104 : vector<1x8x128xf32> to vector<8x128xf32>
    %106 = vector.shape_cast %103 : vector<8x128xf32> to vector<1x8x128xf32>
    tpu.vector_store %arg7[%c1_63, %c0_64, %c0_65], %106 {strides = array<i32>} : memref<2x8x128xf32, #tpu.memory_space<vmem>>, vector<1x8x128xf32>,
    return
  }
}

</mosaic_0001>

<bundles_post_ra>
// kernel: _encoder_step_impl.1
= control target key start
LH: loop header
LB: loop body
LE: loop exit
PB: predicated region body
PF: predicated region fallthrough
CT: control target
= control target key end

     0   :  { %12 = vsyncpa [#allocation6], 0  ;;  %s1465_s0 = inlined_call_operand.hbm [shape: s32[4], index: 0, kind: input, shape index: {}]   ;;  %s1466_s1 = inlined_call_operand.vmem [shape: f32[24,128], index: 1, kind: input, shape index: {}]   ;;  %s1467_s2 = inlined_call_operand.vmem [shape: f32[2,8,128], index: 2, kind: input, shape index: {}, may-alias: {2,7}]   ;;  %s1468_s3 = inlined_call_operand.hbm [shape: f32[256,512], index: 3, kind: input, shape index: {}]   ;;  %s1469_s4 = inlined_call_operand.hbm [shape: f32[256,512], index: 4, kind: input, shape index: {}]   ;;  %s1470_s5 = inlined_call_operand.vmem [shape: f32[1,512], index: 5, kind: input, shape index: {}]   ;;  %s1471_s6 = inlined_call_operand.vmem [shape: f32[1,512], index: 6, kind: input, shape index: {}]   ;;  %s1472_s7 = inlined_call_operand.vmem [shape: f32[2,8,128], index: 7, kind: output, shape index: {}, may-alias: {2,7}]  }
   0x1   :  { %13 = vsyncpa [#allocation5], 0 }
   0x2   :  { %14 = vsyncpa [#allocation9], 0  ;;  %s1275_s26 = scalar_lea.hbm %s1465_s0, 16 }
   0x3   :  { %p1276_p0 = scmp.ne.s32.totalorder %s1465_s0, %s1275_s26  ;;  %p1279_p1 = scmp.lt.u32.totalorder %s1275_s26, %s1465_s0 }
   0x5   :  { %p1281_p2 = pnand %p1279_p1, %p1276_p0 }
   0x7   :  { %1284 = shalt.err (!%p1281_p2)
}
   0x8   :  { %s1343_s8 = smov [#allocation4]   ;;  %s1344_s11 = smov [#allocation7]  }
   0x9   :  { %22 = dma.hbm_to_smem %s1465_s0, 16, %s1343_s8, [#allocation6]  }
   0xa   :  { %s30_s12 = sshll.u32 %s1344_s11, 4  ;;  %s1285_s15 = scalar_lea.hbm %s1468_s3, 16384  ;;  %s31_s12 = int_to_ptr.vmem [resolvable:$true] %s30_s12 }
   0xb   :  { %p1286_p3 = scmp.ne.s32.totalorder %s1468_s3, %s1285_s15  ;;  %p1289_p4 = scmp.lt.u32.totalorder %s1285_s15, %s1468_s3 }
   0xd   :  { %p1291_p5 = pnand %p1289_p4, %p1286_p3 }
   0xf   :  { %1294 = shalt.err (!%p1291_p5)
}
  0x10   :  { %s1295_s20 = scalar_lea.vmem %s31_s12, 16384  ;;  %p1300_p7 = scmp.lt.s32.totalorder %s31_s12, %s31_s12 }
  0x11   :  { %p1296_p6 = scmp.ne.s32.totalorder %s31_s12, %s1295_s20  ;;  %p1301_p8 = scmp.lt.s32.totalorder %s1295_s20, %s1295_s20 }
  0x13   :  { %p1302_p9 = por %p1301_p8, %p1300_p7 }
  0x15   :  { %p1303_p10 = pnand %p1302_p9, %p1296_p6 }
  0x17   :  { %1306 = shalt.err (!%p1303_p10)
}
  0x18   :  { %s1345_s0 = smov 512   ;;  %s1346_s21 = smov 32  }
  0x19   :  { %36 = dma.hbm_to_vmem [thread:$0]  %s1468_s3, 16384, %s31_s12, [#allocation5], %s1345_s0, %s1345_s0, %s1346_s21  }
  0x1a   :  { %s1347_s24 = smov [#allocation8]   ;;  %s1307_s28 = scalar_lea.hbm %s1469_s4, 16384 }
  0x1b   :  { %s42_s25 = sshll.u32 %s1347_s24, 4  ;;  %p1308_p11 = scmp.ne.s32.totalorder %s1469_s4, %s1307_s28  ;;  %s43_s25 = int_to_ptr.vmem [resolvable:$true] %s42_s25 }
  0x1c   :  { %p1311_p12 = scmp.lt.u32.totalorder %s1307_s28, %s1469_s4 }
  0x1e   :  { %p1313_p13 = pnand %p1311_p12, %p1308_p11 }
  0x20   :  { %1316 = shalt.err (!%p1313_p13)
}
  0x21   :  { %s1317_s10 = scalar_lea.vmem %s43_s25, 16384  ;;  %p1322_p1 = scmp.lt.s32.totalorder %s43_s25, %s43_s25 }
  0x22   :  { %p1318_p0 = scmp.ne.s32.totalorder %s43_s25, %s1317_s10  ;;  %p1323_p2 = scmp.lt.s32.totalorder %s1317_s10, %s1317_s10 }
  0x24   :  { %p1324_p3 = por %p1323_p2, %p1322_p1 }
  0x26   :  { %p1325_p4 = pnand %p1324_p3, %p1318_p0 }
  0x28   :  { %1328 = shalt.err (!%p1325_p4)
}
  0x29   :  { %48 = dma.hbm_to_vmem [thread:$0]  %s1469_s4, 16384, %s43_s25, [#allocation9], %s1345_s0, %s1345_s0, %s1346_s21  }
  0x2a   :  { %1329 = dma.done.wait [#allocation6], 16  }
  0x2b   :  { %1330 = vsyncadd [#allocation6], 4294967280 }
  0x2c   :  { %1331 = dma.done.wait [#allocation5], 16384  }
  0x2d   :  { %1332 = vsyncadd [#allocation5], 4294950912 }
  0x2e   :  { %1333 = dma.done.wait [#allocation9], 16384  }
  0x2f   :  { %1334 = vsyncadd [#allocation9], 4294950912 }
  0x30   :  { %62 = sfence }
  0x31   :  { %s63_s12 = sld [smem:[#allocation4]] }
  0x37   :  { %s64_s15 = scalar_lea.vmem %s1466_s1, %s63_s12 }
  0x38   :  { %v82_v0 = vld [vmem:[%s64_s15] sm:$0x1] }
  0x39   :  { %83 = vst [vmem:[#allocation2] sm:$0x1] %v82_v0 }
  0x3a   :  { %108 = vsyncadd [#allocation3], 16  ;;  %s980_s16 = sld [smem:[#allocation4 + $0x1]] }
  0x40   :  { %s110_s4 = scalar_lea.vmem %s1466_s1, %s980_s16 }
  0x41   :  { %v130_v1 = vld [vmem:[%s110_s4] sm:$0x1] }
  0x42   :  { %131 = vst [vmem:[#allocation2 + $0x1] sm:$0x1] %v130_v1 }
  0x43   :  { %156 = vsyncadd [#allocation3 + $0x1], 16  ;;  %s981_s19 = sld [smem:[#allocation4 + $0x2]] }
  0x49   :  { %s158_s21 = scalar_lea.vmem %s1466_s1, %s981_s19 }
  0x4a   :  { %v178_v2 = vld [vmem:[%s158_s21] sm:$0x1] }
  0x4b   :  { %179 = vst [vmem:[#allocation2 + $0x2] sm:$0x1] %v178_v2 }
  0x4c   :  { %204 = vsyncadd [#allocation3 + $0x2], 16  ;;  %s982_s22 = sld [smem:[#allocation4 + $0x3]] }
  0x52   :  { %s206_s25 = scalar_lea.vmem %s1466_s1, %s982_s22 }
  0x53   :  { %v226_v3 = vld [vmem:[%s206_s25] sm:$0x1] }
  0x54   :  { %227 = vst [vmem:[#allocation2 + $0x3] sm:$0x1] %v226_v3 }
  0x55   :  { %252 = vsyncadd [#allocation3 + $0x3], 16  ;;  %v1348_v4 = vmov 0.0  }
  0x56   :  { %253 = vst [vmem:[#allocation2] sm:$0xf0] %v1348_v4 }
  0x57   :  { %1335 = dma.done.wait [#allocation3], 16 }
  0x58   :  { %1336 = vsyncadd [#allocation3], 4294967280 }
  0x59   :  { %1337 = dma.done.wait [#allocation3 + $0x1], 16 }
  0x5a   :  { %1338 = vsyncadd [#allocation3 + $0x1], 4294967280 }
  0x5b   :  { %1339 = dma.done.wait [#allocation3 + $0x2], 16 }
  0x5c   :  { %1340 = vsyncadd [#allocation3 + $0x2], 4294967280 }
  0x5d   :  { %1341 = dma.done.wait [#allocation3 + $0x3], 16 }
  0x5e   :  { %1342 = vsyncadd [#allocation3 + $0x3], 4294967280  ;;  %v269_v5 = vld [vmem:[#allocation7 + $0x8] sm:$0xff]  ;;  %v268_v7 = vld [vmem:[#allocation7] sm:$0xff] }
  0x5f   :  { %v273_v6 = vld [vmem:[#allocation7 + $0x28] sm:$0xff]  ;;  %v272_v9 = vld [vmem:[#allocation7 + $0x20] sm:$0xff]  ;;  %v271_v26 = vld [vmem:[#allocation7 + $0x18] sm:$0xff] }
  0x60   :  { %v993_v8 = vpack.c.bf16 %v273_v6, %v269_v5  ;;  %v277_v10 = vld [vmem:[#allocation7 + $0x48] sm:$0xff]  ;;  %v995_v12 = vpack.c.bf16 %v272_v9, %v268_v7  ;;  %v276_v14 = vld [vmem:[#allocation7 + $0x40] sm:$0xff]  ;;  %v275_v30 = vld [vmem:[#allocation7 + $0x38] sm:$0xff] }
  0x61   :  { %v281_v11 = vld [vmem:[#allocation7 + $0x68] sm:$0xff]  ;;  %v280_v15 = vld [vmem:[#allocation7 + $0x60] sm:$0xff]  ;;  %v1057_v32 = vpack.c.bf16 %v275_v30, %v271_v26  ;;  %v270_v33 = vld [vmem:[#allocation7 + $0x10] sm:$0xff] }
  0x62   :  { %v997_v13 = vpack.c.bf16 %v281_v11, %v277_v10  ;;  %v285_v16 = vld [vmem:[#allocation7 + $0x88] sm:$0xff]  ;;  %994 = vmatprep.subr.bf16.mxu0 %v993_v8  ;;  %v999_v18 = vpack.c.bf16 %v280_v15, %v276_v14  ;;  %v284_v20 = vld [vmem:[#allocation7 + $0x80] sm:$0xff]  ;;  %v274_v34 = vld [vmem:[#allocation7 + $0x30] sm:$0xff] }
  0x63   :  { %v289_v17 = vld [vmem:[#allocation7 + $0xa8] sm:$0xff]  ;;  %996 = vmatpush1.bf16.msra.mxu0 %v995_v12  ;;  %v288_v21 = vld [vmem:[#allocation7 + $0xa0] sm:$0xff]  ;;  %v1059_v35 = vpack.c.bf16 %v274_v34, %v270_v33  ;;  %v279_v36 = vld [vmem:[#allocation7 + $0x58] sm:$0xff]  ;;  %1058 = vmatprep.subr.bf16.mxu1 %v1057_v32 }
  0x64   :  { %998 = vmatprep.subr.bf16.mxu0 %v997_v13  ;;  %v1001_v19 = vpack.c.bf16 %v289_v17, %v285_v16  ;;  %v293_v22 = vld [vmem:[#allocation7 + $0xc8] sm:$0xff]  ;;  %v1003_v24 = vpack.c.bf16 %v288_v21, %v284_v20  ;;  %v292_v25 = vld [vmem:[#allocation7 + $0xc0] sm:$0xff]  ;;  %v283_v37 = vld [vmem:[#allocation7 + $0x78] sm:$0xff] }
  0x65   :  { %v297_v23 = vld [vmem:[#allocation7 + $0xe8] sm:$0xff]  ;;  %v296_v28 = vld [vmem:[#allocation7 + $0xe0] sm:$0xff]  ;;  %v1061_v40 = vpack.c.bf16 %v283_v37, %v279_v36  ;;  %v278_v41 = vld [vmem:[#allocation7 + $0x50] sm:$0xff]  ;;  %1060 = vmatpush1.bf16.msra.mxu1 %v1059_v35 }
  0x66   :  { %v1005_v27 = vpack.c.bf16 %v297_v23, %v293_v22  ;;  %v301_v29 = vld [vmem:[#allocation7 + $0x108] sm:$0xff]  ;;  %v1007_v38 = vpack.c.bf16 %v296_v28, %v292_v25  ;;  %v300_v39 = vld [vmem:[#allocation7 + $0x100] sm:$0xff]  ;;  %v282_v45 = vld [vmem:[#allocation7 + $0x70] sm:$0xff] }
  0x67   :  { %1000 = vmatpush1.bf16.msra.mxu0 %v999_v18  ;;  %v305_v31 = vld [vmem:[#allocation7 + $0x128] sm:$0xff]  ;;  %v304_v43 = vld [vmem:[#allocation7 + $0x120] sm:$0xff]  ;;  %1062 = vmatprep.subr.bf16.mxu1 %v1061_v40  ;;  %v1063_v47 = vpack.c.bf16 %v282_v45, %v278_v41  ;;  %v287_v48 = vld [vmem:[#allocation7 + $0x98] sm:$0xff] }
  0x68   :  { %1002 = vmatprep.subr.bf16.mxu0 %v1001_v19  ;;  %v1009_v42 = vpack.c.bf16 %v305_v31, %v301_v29  ;;  %v309_v44 = vld [vmem:[#allocation7 + $0x148] sm:$0xff]  ;;  %v291_v49 = vld [vmem:[#allocation7 + $0xb8] sm:$0xff]  ;;  %v286_v51 = vld [vmem:[#allocation7 + $0x90] sm:$0xff]  ;;  %v1011_v53 = vpack.c.bf16 %v304_v43, %v300_v39 }
  0x69   :  { %v313_v46 = vld [vmem:[#allocation7 + $0x168] sm:$0xff]  ;;  %v1065_v50 = vpack.c.bf16 %v291_v49, %v287_v48  ;;  %v290_v52 = vld [vmem:[#allocation7 + $0xb0] sm:$0xff]  ;;  %v308_v54 = vld [vmem:[#allocation7 + $0x140] sm:$0xff]  ;;  %1064 = vmatpush1.bf16.msra.mxu1 %v1063_v47 }
  0x6a   :  { %v295_v55 = vld [vmem:[#allocation7 + $0xd8] sm:$0xff]  ;;  %v1013_v56 = vpack.c.bf16 %v313_v46, %v309_v44  ;;  %v312_v57 = vld [vmem:[#allocation7 + $0x160] sm:$0xff]  ;;  %v317_v58 = vld [vmem:[#allocation7 + $0x188] sm:$0xff]  ;;  %v1067_v59 = vpack.c.bf16 %v290_v52, %v286_v51 }
  0x6b   :  { %1004 = vmatpush1.bf16.msra.mxu0 %v1003_v24  ;;  %v299_v60 = vld [vmem:[#allocation7 + $0xf8] sm:$0xff]  ;;  %v321_v61 = vld [vmem:[#allocation7 + $0x1a8] sm:$0xff]  ;;  %1066 = vmatprep.subr.bf16.mxu1 %v1065_v50  ;;  %v294_v63 = vld [vmem:[#allocation7 + $0xd0] sm:$0xff]  ;;  %v1015_v3 = vpack.c.bf16 %v312_v57, %v308_v54 }
  0x6c   :  { %1006 = vmatprep.subr.bf16.mxu0 %v1005_v27  ;;  %v1069_v62 = vpack.c.bf16 %v299_v60, %v295_v55  ;;  %v298_v0 = vld [vmem:[#allocation7 + $0xf0] sm:$0xff]  ;;  %v303_v1 = vld [vmem:[#allocation7 + $0x118] sm:$0xff]  ;;  %v1017_v4 = vpack.c.bf16 %v321_v61, %v317_v58  ;;  %v316_v5 = vld [vmem:[#allocation7 + $0x180] sm:$0xff] }
  0x6d   :  { %v307_v2 = vld [vmem:[#allocation7 + $0x138] sm:$0xff]  ;;  %v320_v6 = vld [vmem:[#allocation7 + $0x1a0] sm:$0xff]  ;;  %v325_v7 = vld [vmem:[#allocation7 + $0x1c8] sm:$0xff]  ;;  %1068 = vmatpush1.bf16.msra.mxu1 %v1067_v59  ;;  %v1071_v8 = vpack.c.bf16 %v298_v0, %v294_v63 }
  0x6e   :  { %v329_v9 = vld [vmem:[#allocation7 + $0x1e8] sm:$0xff]  ;;  %1070 = vmatprep.subr.bf16.mxu1 %v1069_v62  ;;  %v1073_v10 = vpack.c.bf16 %v307_v2, %v303_v1  ;;  %v302_v11 = vld [vmem:[#allocation7 + $0x110] sm:$0xff]  ;;  %v311_v13 = vld [vmem:[#allocation7 + $0x158] sm:$0xff]  ;;  %v1019_v15 = vpack.c.bf16 %v320_v6, %v316_v5 }
  0x6f   :  { %1008 = vmatpush1.bf16.msra.mxu0 %v1007_v38  ;;  %v306_v12 = vld [vmem:[#allocation7 + $0x130] sm:$0xff]  ;;  %v315_v14 = vld [vmem:[#allocation7 + $0x178] sm:$0xff]  ;;  %v1021_v16 = vpack.c.bf16 %v329_v9, %v325_v7  ;;  %v324_v17 = vld [vmem:[#allocation7 + $0x1c0] sm:$0xff] }
  0x70   :  { %1010 = vmatprep.subr.bf16.mxu0 %v1009_v42  ;;  %v328_v18 = vld [vmem:[#allocation7 + $0x1e0] sm:$0xff]  ;;  %v333_v19 = vld [vmem:[#allocation7 + $0x208] sm:$0xff]  ;;  %v1075_v20 = vpack.c.bf16 %v306_v12, %v302_v11  ;;  %v1077_v22 = vpack.c.bf16 %v315_v14, %v311_v13  ;;  %v310_v23 = vld [vmem:[#allocation7 + $0x150] sm:$0xff] }
  0x71   :  { %1072 = vmatpush1.bf16.msra.mxu1 %v1071_v8  ;;  %v337_v21 = vld [vmem:[#allocation7 + $0x228] sm:$0xff]  ;;  %v314_v24 = vld [vmem:[#allocation7 + $0x170] sm:$0xff]  ;;  %v319_v25 = vld [vmem:[#allocation7 + $0x198] sm:$0xff]  ;;  %v1023_v27 = vpack.c.bf16 %v328_v18, %v324_v17 }
  0x72   :  { %1074 = vmatprep.subr.bf16.mxu1 %v1073_v10  ;;  %v323_v26 = vld [vmem:[#allocation7 + $0x1b8] sm:$0xff]  ;;  %v1025_v28 = vpack.c.bf16 %v337_v21, %v333_v19  ;;  %v332_v29 = vld [vmem:[#allocation7 + $0x200] sm:$0xff]  ;;  %v341_v31 = vld [vmem:[#allocation7 + $0x248] sm:$0xff]  ;;  %v1079_v32 = vpack.c.bf16 %v314_v24, %v310_v23 }
  0x73   :  { %1012 = vmatpush1.bf16.msra.mxu0 %v1011_v53  ;;  %v336_v30 = vld [vmem:[#allocation7 + $0x220] sm:$0xff]  ;;  %v345_v33 = vld [vmem:[#allocation7 + $0x268] sm:$0xff]  ;;  %v1081_v34 = vpack.c.bf16 %v323_v26, %v319_v25  ;;  %v318_v35 = vld [vmem:[#allocation7 + $0x190] sm:$0xff] }
  0x74   :  { %1014 = vmatprep.subr.bf16.mxu0 %v1013_v56  ;;  %v322_v36 = vld [vmem:[#allocation7 + $0x1b0] sm:$0xff]  ;;  %v327_v37 = vld [vmem:[#allocation7 + $0x1d8] sm:$0xff]  ;;  %v1027_v39 = vpack.c.bf16 %v336_v30, %v332_v29  ;;  %v340_v40 = vld [vmem:[#allocation7 + $0x240] sm:$0xff]  ;;  %v1029_v41 = vpack.c.bf16 %v345_v33, %v341_v31 }
  0x75   :  { %1076 = vmatpush1.bf16.msra.mxu1 %v1075_v20  ;;  %v331_v38 = vld [vmem:[#allocation7 + $0x1f8] sm:$0xff]  ;;  %v344_v42 = vld [vmem:[#allocation7 + $0x260] sm:$0xff]  ;;  %v349_v43 = vld [vmem:[#allocation7 + $0x288] sm:$0xff]  ;;  %v1083_v45 = vpack.c.bf16 %v322_v36, %v318_v35 }
  0x76   :  { %1078 = vmatprep.subr.bf16.mxu1 %v1077_v22  ;;  %v353_v44 = vld [vmem:[#allocation7 + $0x2a8] sm:$0xff]  ;;  %v1085_v46 = vpack.c.bf16 %v331_v38, %v327_v37  ;;  %v326_v47 = vld [vmem:[#allocation7 + $0x1d0] sm:$0xff]  ;;  %v335_v50 = vld [vmem:[#allocation7 + $0x218] sm:$0xff]  ;;  %v1031_v53 = vpack.c.bf16 %v344_v42, %v340_v40 }
  0x77   :  { %1016 = vmatpush1.bf16.msra.mxu0 %v1015_v3  ;;  %v330_v48 = vld [vmem:[#allocation7 + $0x1f0] sm:$0xff]  ;;  %v339_v51 = vld [vmem:[#allocation7 + $0x238] sm:$0xff]  ;;  %v1033_v54 = vpack.c.bf16 %v353_v44, %v349_v43  ;;  %v348_v55 = vld [vmem:[#allocation7 + $0x280] sm:$0xff] }
  0x78   :  { %1018 = vmatprep.subr.bf16.mxu0 %v1017_v4  ;;  %v1440_v49 = vld [vmem:[%s1467_s2] sm:$0xff]  ;;  %v1446_v52 = vld [vmem:[%s1467_s2 + $0x8] sm:$0xff]  ;;  %v352_v56 = vld [vmem:[#allocation7 + $0x2a0] sm:$0xff]  ;;  %v1087_v58 = vpack.c.bf16 %v330_v48, %v326_v47  ;;  %v1089_v60 = vpack.c.bf16 %v339_v51, %v335_v50 }
  0x79   :  { %1080 = vmatpush1.bf16.msra.mxu1 %v1079_v32  ;;  %482 = vmatprep.mubr.f32.mxu0 %v1440_v49  ;;  %v357_v57 = vld [vmem:[#allocation7 + $0x2c8] sm:$0xff]  ;;  %v334_v61 = vld [vmem:[#allocation7 + $0x210] sm:$0xff]  ;;  %v343_v63 = vld [vmem:[#allocation7 + $0x258] sm:$0xff]  ;;  %v1035_v1 = vpack.c.bf16 %v352_v56, %v348_v55 }
  0x7a   :  { %1082 = vmatprep.subr.bf16.mxu1 %v1081_v34  ;;  %553 = vmatprep.mubr.f32.mxu1 %v1440_v49  ;;  %v361_v59 = vld [vmem:[#allocation7 + $0x2e8] sm:$0xff]  ;;  %v338_v62 = vld [vmem:[#allocation7 + $0x230] sm:$0xff]  ;;  %v347_v0 = vld [vmem:[#allocation7 + $0x278] sm:$0xff] }
  0x7b   :  { %1020 = vmatpush1.bf16.msra.mxu0 %v1019_v15  ;;  %v1037_v2 = vpack.c.bf16 %v361_v59, %v357_v57  ;;  %v356_v3 = vld [vmem:[#allocation7 + $0x2c0] sm:$0xff]  ;;  %v365_v5 = vld [vmem:[#allocation7 + $0x308] sm:$0xff]  ;;  %v1091_v6 = vpack.c.bf16 %v338_v62, %v334_v61  ;;  %v1093_v8 = vpack.c.bf16 %v347_v0, %v343_v63  ;;  %v342_v9 = vld [vmem:[#allocation7 + $0x250] sm:$0xff] }
  0x7c   :  { %1022 = vmatprep.subr.bf16.mxu0 %v1021_v16  ;;  %v360_v4 = vld [vmem:[#allocation7 + $0x2e0] sm:$0xff]  ;;  %v369_v7 = vld [vmem:[#allocation7 + $0x328] sm:$0xff]  ;;  %v346_v10 = vld [vmem:[#allocation7 + $0x270] sm:$0xff] }
  0x7d   :  { %1084 = vmatpush1.bf16.msra.mxu1 %v1083_v45  ;;  %v351_v11 = vld [vmem:[#allocation7 + $0x298] sm:$0xff]  ;;  %v1039_v13 = vpack.c.bf16 %v360_v4, %v356_v3  ;;  %v1041_v14 = vpack.c.bf16 %v369_v7, %v365_v5  ;;  %v364_v15 = vld [vmem:[#allocation7 + $0x300] sm:$0xff]  ;;  %v373_v17 = vld [vmem:[#allocation7 + $0x348] sm:$0xff]  ;;  %v1095_v18 = vpack.c.bf16 %v346_v10, %v342_v9 }
  0x7e   :  { %1086 = vmatprep.subr.bf16.mxu1 %v1085_v46  ;;  %v355_v12 = vld [vmem:[#allocation7 + $0x2b8] sm:$0xff]  ;;  %v368_v16 = vld [vmem:[#allocation7 + $0x320] sm:$0xff]  ;;  %v377_v19 = vld [vmem:[#allocation7 + $0x368] sm:$0xff] }
  0x7f   :  { %1024 = vmatpush1.bf16.msra.mxu0 %v1023_v27  ;;  %v1097_v20 = vpack.c.bf16 %v355_v12, %v351_v11  ;;  %v350_v21 = vld [vmem:[#allocation7 + $0x290] sm:$0xff]  ;;  %v359_v23 = vld [vmem:[#allocation7 + $0x2d8] sm:$0xff]  ;;  %v1043_v25 = vpack.c.bf16 %v368_v16, %v364_v15  ;;  %v1045_v26 = vpack.c.bf16 %v377_v19, %v373_v17  ;;  %v372_v27 = vld [vmem:[#allocation7 + $0x340] sm:$0xff] }
  0x80   :  { %1026 = vmatprep.subr.bf16.mxu0 %v1025_v28  ;;  %v354_v22 = vld [vmem:[#allocation7 + $0x2b0] sm:$0xff]  ;;  %v363_v24 = vld [vmem:[#allocation7 + $0x2f8] sm:$0xff]  ;;  %v376_v28 = vld [vmem:[#allocation7 + $0x360] sm:$0xff] }
  0x81   :  { %1088 = vmatpush1.bf16.msra.mxu1 %v1087_v58  ;;  %v381_v29 = vld [vmem:[#allocation7 + $0x388] sm:$0xff]  ;;  %v1099_v30 = vpack.c.bf16 %v354_v22, %v350_v21  ;;  %v1101_v32 = vpack.c.bf16 %v363_v24, %v359_v23  ;;  %v358_v33 = vld [vmem:[#allocation7 + $0x2d0] sm:$0xff]  ;;  %v367_v35 = vld [vmem:[#allocation7 + $0x318] sm:$0xff]  ;;  %v1047_v37 = vpack.c.bf16 %v376_v28, %v372_v27 }
  0x82   :  { %1090 = vmatprep.subr.bf16.mxu1 %v1089_v60  ;;  %v385_v31 = vld [vmem:[#allocation7 + $0x3a8] sm:$0xff]  ;;  %v362_v34 = vld [vmem:[#allocation7 + $0x2f0] sm:$0xff]  ;;  %v371_v36 = vld [vmem:[#allocation7 + $0x338] sm:$0xff] }
  0x83   :  { %1028 = vmatpush1.bf16.msra.mxu0 %v1027_v39  ;;  %v1049_v38 = vpack.c.bf16 %v385_v31, %v381_v29  ;;  %v380_v39 = vld [vmem:[#allocation7 + $0x380] sm:$0xff]  ;;  %v1103_v42 = vpack.c.bf16 %v362_v34, %v358_v33  ;;  %v393_v43 = vld [vmem:[#allocation7 + $0x3e8] sm:$0xff]  ;;  %v1105_v44 = vpack.c.bf16 %v371_v36, %v367_v35  ;;  %v366_v45 = vld [vmem:[#allocation7 + $0x310] sm:$0xff] }
  0x84   :  { %1030 = vmatprep.subr.bf16.mxu0 %v1029_v41  ;;  %v384_v40 = vld [vmem:[#allocation7 + $0x3a0] sm:$0xff]  ;;  %v389_v41 = vld [vmem:[#allocation7 + $0x3c8] sm:$0xff]  ;;  %v370_v46 = vld [vmem:[#allocation7 + $0x330] sm:$0xff] }
  0x85   :  { %1092 = vmatpush1.bf16.msra.mxu1 %v1091_v6  ;;  %v375_v47 = vld [vmem:[#allocation7 + $0x358] sm:$0xff]  ;;  %v1051_v50 = vpack.c.bf16 %v384_v40, %v380_v39  ;;  %v1053_v51 = vpack.c.bf16 %v393_v43, %v389_v41  ;;  %v1107_v55 = vpack.c.bf16 %v370_v46, %v366_v45  ;;  %v374_v56 = vld [vmem:[#allocation7 + $0x350] sm:$0xff]  ;;  %v587_v59 = vld [vmem:[#allocation8 + $0x8] sm:$0xff] }
  0x86   :  { %1094 = vmatprep.subr.bf16.mxu1 %v1093_v8  ;;  %v379_v48 = vld [vmem:[#allocation7 + $0x378] sm:$0xff]  ;;  %v378_v58 = vld [vmem:[#allocation7 + $0x370] sm:$0xff]  ;;  %v591_v60 = vld [vmem:[#allocation8 + $0x28] sm:$0xff] }
  0x87   :  { %1032 = vmatpush1.bf16.msra.mxu0 %v1031_v53  ;;  %v388_v53 = vld [vmem:[#allocation7 + $0x3c0] sm:$0xff]  ;;  %v1109_v57 = vpack.c.bf16 %v379_v48, %v375_v47  ;;  %v383_v61 = vld [vmem:[#allocation7 + $0x398] sm:$0xff]  ;;  %v1111_v0 = vpack.c.bf16 %v378_v58, %v374_v56  ;;  %v386_v6 = vld [vmem:[#allocation7 + $0x3b0] sm:$0xff] }
  0x88   :  { %1034 = vmatprep.subr.bf16.mxu0 %v1033_v54  ;;  %v392_v54 = vld [vmem:[#allocation7 + $0x3e0] sm:$0xff]  ;;  %v387_v62 = vld [vmem:[#allocation7 + $0x3b8] sm:$0xff]  ;;  %v595_v7 = vld [vmem:[#allocation8 + $0x48] sm:$0xff] }
  0x89   :  { %1096 = vmatpush1.bf16.msra.mxu1 %v1095_v18  ;;  %v1055_v63 = vpack.c.bf16 %v392_v54, %v388_v53  ;;  %v586_v3 = vld [vmem:[#allocation8] sm:$0xff]  ;;  %v1113_v5 = vpack.c.bf16 %v387_v62, %v383_v61  ;;  %v599_v8 = vld [vmem:[#allocation8 + $0x68] sm:$0xff]  ;;  %v391_v9 = vld [vmem:[#allocation7 + $0x3d8] sm:$0xff] }
  0x8a   :  { %1098 = vmatprep.subr.bf16.mxu1 %v1097_v20  ;;  %v590_v4 = vld [vmem:[#allocation8 + $0x20] sm:$0xff]  ;;  %v395_v10 = vld [vmem:[#allocation7 + $0x3f8] sm:$0xff]  ;;  %v266_v11 = vld [vmem:[#allocation2] sm:$0xff] }
  0x8b   :  { %1036 = vmatpush1.bf16.msra.mxu0 %v1035_v1  ;;  %v382_v1 = vld [vmem:[#allocation7 + $0x390] sm:$0xff]  ;;  %v1123_v12 = vpack.c.bf16 %v590_v4, %v586_v3  ;;  %v594_v15 = vld [vmem:[#allocation8 + $0x40] sm:$0xff]  ;;  %v1117_v17 = vpack.c.bf16 %v395_v10, %v391_v9  ;;  %v589_v20 = vld [vmem:[#allocation8 + $0x18] sm:$0xff] }
  0x8c   :  { %1038 = vmatprep.subr.bf16.mxu0 %v1037_v2  ;;  %v1121_v2 = vpack.c.bf16 %v591_v60, %v587_v59  ;;  %v598_v16 = vld [vmem:[#allocation8 + $0x60] sm:$0xff]  ;;  %v390_v18 = vld [vmem:[#allocation7 + $0x3d0] sm:$0xff]  ;;  %v593_v21 = vld [vmem:[#allocation8 + $0x38] sm:$0xff] }
  0x8d   :  { %1100 = vmatpush1.bf16.msra.mxu1 %v1099_v30  ;;  %v394_v19 = vld [vmem:[#allocation7 + $0x3f0] sm:$0xff]  ;;  %v1127_v22 = vpack.c.bf16 %v598_v16, %v594_v15  ;;  %v1185_v24 = vpack.c.bf16 %v593_v21, %v589_v20  ;;  %v597_v27 = vld [vmem:[#allocation8 + $0x58] sm:$0xff]  ;;  %v603_v34 = vld [vmem:[#allocation8 + $0x88] sm:$0xff] }
  0x8e   :  { %1102 = vmatprep.subr.bf16.mxu1 %v1101_v32  ;;  %v1119_v23 = vpack.c.bf16 %v394_v19, %v390_v18  ;;  %v601_v28 = vld [vmem:[#allocation8 + $0x78] sm:$0xff]  ;;  %v596_v31 = vld [vmem:[#allocation8 + $0x50] sm:$0xff]  ;;  %v607_v35 = vld [vmem:[#allocation8 + $0xa8] sm:$0xff] }
  0x8f   :  { %1040 = vmatpush1.bf16.msra.mxu0 %v1039_v13  ;;  %v1115_v13 = vpack.c.bf16 %v386_v6, %v382_v1  ;;  %v1189_v30 = vpack.c.bf16 %v601_v28, %v597_v27  ;;  %v600_v32 = vld [vmem:[#allocation8 + $0x70] sm:$0xff]  ;;  %v605_v36 = vld [vmem:[#allocation8 + $0x98] sm:$0xff]  ;;  %v602_v39 = vld [vmem:[#allocation8 + $0x80] sm:$0xff] }
  0x90   :  { %1042 = vmatprep.subr.bf16.mxu0 %v1041_v14  ;;  %v1125_v14 = vpack.c.bf16 %v599_v8, %v595_v7  ;;  %v1191_v33 = vpack.c.bf16 %v600_v32, %v596_v31  ;;  %v606_v40 = vld [vmem:[#allocation8 + $0xa0] sm:$0xff]  ;;  %v604_v43 = vld [vmem:[#allocation8 + $0x90] sm:$0xff]  ;;  %v611_v46 = vld [vmem:[#allocation8 + $0xc8] sm:$0xff] }
  0x91   :  { %1104 = vmatpush1.bf16.msra.mxu1 %v1103_v42  ;;  %v1131_v42 = vpack.c.bf16 %v606_v40, %v602_v39  ;;  %v615_v47 = vld [vmem:[#allocation8 + $0xe8] sm:$0xff]  ;;  %v613_v48 = vld [vmem:[#allocation8 + $0xd8] sm:$0xff]  ;;  %v610_v53 = vld [vmem:[#allocation8 + $0xc0] sm:$0xff] }
  0x92   :  { %1106 = vmatprep.subr.bf16.mxu1 %v1105_v44  ;;  %v608_v44 = vld [vmem:[#allocation8 + $0xb0] sm:$0xff]  ;;  %v614_v54 = vld [vmem:[#allocation8 + $0xe0] sm:$0xff]  ;;  %v619_v60 = vld [vmem:[#allocation8 + $0x108] sm:$0xff] }
  0x93   :  { %1044 = vmatpush1.bf16.msra.mxu0 %v1043_v25  ;;  %v588_v25 = vld [vmem:[#allocation8 + $0x10] sm:$0xff]  ;;  %v1195_v45 = vpack.c.bf16 %v608_v44, %v604_v43  ;;  %v1135_v56 = vpack.c.bf16 %v614_v54, %v610_v53  ;;  %v623_v61 = vld [vmem:[#allocation8 + $0x128] sm:$0xff]  ;;  %v621_v62 = vld [vmem:[#allocation8 + $0x118] sm:$0xff] }
  0x94   :  { %1046 = vmatprep.subr.bf16.mxu0 %v1045_v26  ;;  %v592_v26 = vld [vmem:[#allocation8 + $0x30] sm:$0xff]  ;;  %v618_v1 = vld [vmem:[#allocation8 + $0x100] sm:$0xff]  ;;  %v627_v8 = vld [vmem:[#allocation8 + $0x148] sm:$0xff] }
  0x95   :  { %1108 = vmatpush1.bf16.msra.mxu1 %v1107_v55  ;;  %v1187_v29 = vpack.c.bf16 %v592_v26, %v588_v25  ;;  %v616_v58 = vld [vmem:[#allocation8 + $0xf0] sm:$0xff]  ;;  %v631_v9 = vld [vmem:[#allocation8 + $0x168] sm:$0xff]  ;;  %v629_v10 = vld [vmem:[#allocation8 + $0x158] sm:$0xff] }
  0x96   :  { %1110 = vmatprep.subr.bf16.mxu1 %v1109_v57  ;;  %v612_v57 = vld [vmem:[#allocation8 + $0xd0] sm:$0xff]  ;;  %v635_v20 = vld [vmem:[#allocation8 + $0x188] sm:$0xff]  ;;  %v634_v25 = vld [vmem:[#allocation8 + $0x180] sm:$0xff] }
  0x97   :  { %1048 = vmatpush1.bf16.msra.mxu0 %v1047_v37  ;;  %v1129_v37 = vpack.c.bf16 %v607_v35, %v603_v34  ;;  %v1199_v59 = vpack.c.bf16 %v616_v58, %v612_v57  ;;  %v624_v6 = vld [vmem:[#allocation8 + $0x130] sm:$0xff]  ;;  %v639_v21 = vld [vmem:[#allocation8 + $0x1a8] sm:$0xff]  ;;  %v638_v26 = vld [vmem:[#allocation8 + $0x1a0] sm:$0xff] }
  0x98   :  { %1050 = vmatprep.subr.bf16.mxu0 %v1049_v38  ;;  %v609_v38 = vld [vmem:[#allocation8 + $0xb8] sm:$0xff]  ;;  %v632_v18 = vld [vmem:[#allocation8 + $0x170] sm:$0xff]  ;;  %v1147_v28 = vpack.c.bf16 %v638_v26, %v634_v25  ;;  %v643_v32 = vld [vmem:[#allocation8 + $0x1c8] sm:$0xff] }
  0x99   :  { %1112 = vmatpush1.bf16.msra.mxu1 %v1111_v0  ;;  %v1193_v41 = vpack.c.bf16 %v609_v38, %v605_v36  ;;  %v625_v0 = vld [vmem:[#allocation8 + $0x138] sm:$0xff]  ;;  %v646_v38 = vld [vmem:[#allocation8 + $0x1e0] sm:$0xff]  ;;  %v651_v44 = vld [vmem:[#allocation8 + $0x208] sm:$0xff] }
  0x9a   :  { %1114 = vmatprep.subr.bf16.mxu1 %v1113_v5  ;;  %v1201_v3 = vpack.c.bf16 %v625_v0, %v621_v62  ;;  %v620_v5 = vld [vmem:[#allocation8 + $0x110] sm:$0xff]  ;;  %v645_v34 = vld [vmem:[#allocation8 + $0x1d8] sm:$0xff]  ;;  %v659_v58 = vld [vmem:[#allocation8 + $0x248] sm:$0xff] }
  0x9b   :  { %1052 = vmatpush1.bf16.msra.mxu0 %v1051_v50  ;;  %v1133_v50 = vpack.c.bf16 %v615_v47, %v611_v46  ;;  %v1203_v7 = vpack.c.bf16 %v624_v6, %v620_v5  ;;  %v649_v36 = vld [vmem:[#allocation8 + $0x1f8] sm:$0xff]  ;;  %v662_v0 = vld [vmem:[#allocation8 + $0x260] sm:$0xff]  ;;  %v667_v6 = vld [vmem:[#allocation8 + $0x288] sm:$0xff] }
  0x9c   :  { %1054 = vmatprep.subr.bf16.mxu0 %v1053_v51  ;;  %v617_v51 = vld [vmem:[#allocation8 + $0xf8] sm:$0xff]  ;;  %v1213_v39 = vpack.c.bf16 %v649_v36, %v645_v34  ;;  %v686_v36 = vld [vmem:[#allocation8 + $0x320] sm:$0xff] }
  0x9d   :  { %1116 = vmatpush1.bf16.msra.mxu1 %v1115_v13  ;;  %v1197_v55 = vpack.c.bf16 %v617_v51, %v613_v48  ;;  %v626_v13 = vld [vmem:[#allocation8 + $0x140] sm:$0xff]  ;;  %v653_v46 = vld [vmem:[#allocation8 + $0x218] sm:$0xff] }
  0x9e   :  { %1118 = vmatprep.subr.bf16.mxu1 %v1117_v17  ;;  %v628_v17 = vld [vmem:[#allocation8 + $0x150] sm:$0xff]  ;;  %v657_v48 = vld [vmem:[#allocation8 + $0x238] sm:$0xff]  ;;  %v654_v51 = vld [vmem:[#allocation8 + $0x220] sm:$0xff] }
  0x9f   :  { %1056 = vmatpush1.bf16.msra.mxu0 %v1055_v63  ;;  %v1137_v63 = vpack.c.bf16 %v623_v61, %v619_v60  ;;  %v1207_v19 = vpack.c.bf16 %v632_v18, %v628_v17  ;;  %v1217_v53 = vpack.c.bf16 %v657_v48, %v653_v46  ;;  %v661_v60 = vld [vmem:[#allocation8 + $0x258] sm:$0xff]  ;;  %v675_v18 = vld [vmem:[#allocation8 + $0x2c8] sm:$0xff]  ;;  %v694_v48 = vld [vmem:[#allocation8 + $0x360] sm:$0xff] }
  0xa0   :  { %1122 = vmatprep.subr.bf16.mxu0 %v1121_v2  ;;  %v622_v2 = vld [vmem:[#allocation8 + $0x120] sm:$0xff]  ;;  %v665_v62 = vld [vmem:[#allocation8 + $0x278] sm:$0xff] }
  0xa1   :  { %1120 = vmatpush1.bf16.msra.mxu1 %v1119_v23  ;;  %v1139_v4 = vpack.c.bf16 %v622_v2, %v618_v1  ;;  %v1145_v23 = vpack.c.bf16 %v639_v21, %v635_v20  ;;  %v1221_v1 = vpack.c.bf16 %v665_v62, %v661_v60  ;;  %v677_v20 = vld [vmem:[#allocation8 + $0x2d8] sm:$0xff]  ;;  %v702_v62 = vld [vmem:[#allocation8 + $0x3a0] sm:$0xff] }
  0xa2   :  { %483 = vmatmul.mubr.f32.vlgmr.msra.gmra.mrb[0].mxu0 %v266_v11  ;;  %1186 = vmatprep.subr.bf16.mxu1 %v1185_v24  ;;  %v641_v24 = vld [vmem:[#allocation8 + $0x1b8] sm:$0xff] }
  0xa3   :  { %1124 = vmatpush1.bf16.msra.mxu0 %v1123_v12  ;;  %800 = vmatprep.mubr.f32.mxu0 %v1446_v52  ;;  %v633_v12 = vld [vmem:[#allocation8 + $0x178] sm:$0xff] }
  0xa4   :  { %1126 = vmatprep.subr.bf16.mxu0 %v1125_v14  ;;  %554 = vmatmul.mubr.f32.vlgmr.msra.gmra.mrb[0].mxu1 %v266_v11  ;;  %v1141_v11 = vpack.c.bf16 %v631_v9, %v627_v8  ;;  %v630_v14 = vld [vmem:[#allocation8 + $0x160] sm:$0xff]  ;;  %v1205_v15 = vpack.c.bf16 %v633_v12, %v629_v10  ;;  %v669_v8 = vld [vmem:[#allocation8 + $0x298] sm:$0xff] }
  0xa5   :  { %1188 = vmatpush1.bf16.msra.mxu1 %v1187_v29  ;;  %871 = vmatprep.mubr.f32.mxu1 %v1446_v52  ;;  %v1143_v16 = vpack.c.bf16 %v630_v14, %v626_v13  ;;  %v636_v29 = vld [vmem:[#allocation8 + $0x190] sm:$0xff]  ;;  %v673_v10 = vld [vmem:[#allocation8 + $0x2b8] sm:$0xff]  ;;  %v670_v12 = vld [vmem:[#allocation8 + $0x2a0] sm:$0xff] }
  0xa6   :  { %1190 = vmatprep.subr.bf16.mxu1 %v1189_v30  ;;  %v640_v30 = vld [vmem:[#allocation8 + $0x1b0] sm:$0xff]  ;;  %v1225_v13 = vpack.c.bf16 %v673_v10, %v669_v8  ;;  %v689_v34 = vld [vmem:[#allocation8 + $0x338] sm:$0xff]  ;;  %v710_v10 = vld [vmem:[#allocation8 + $0x3e0] sm:$0xff] }
  0xa7   :  { %1128 = vmatpush1.bf16.msra.mxu0 %v1127_v22  ;;  %v637_v22 = vld [vmem:[#allocation8 + $0x198] sm:$0xff]  ;;  %v1211_v31 = vpack.c.bf16 %v640_v30, %v636_v29  ;;  %v683_v30 = vld [vmem:[#allocation8 + $0x308] sm:$0xff] }
  0xa8   :  { %1130 = vmatprep.subr.bf16.mxu0 %v1129_v37  ;;  %v1209_v27 = vpack.c.bf16 %v641_v24, %v637_v22  ;;  %v642_v37 = vld [vmem:[#allocation8 + $0x1c0] sm:$0xff]  ;;  %v681_v22 = vld [vmem:[#allocation8 + $0x2f8] sm:$0xff] }
  0xa9   :  { %1192 = vmatpush1.bf16.msra.mxu1 %v1191_v33  ;;  %v647_v33 = vld [vmem:[#allocation8 + $0x1e8] sm:$0xff]  ;;  %v1151_v40 = vpack.c.bf16 %v646_v38, %v642_v37  ;;  %v678_v24 = vld [vmem:[#allocation8 + $0x2e0] sm:$0xff]  ;;  %v1229_v25 = vpack.c.bf16 %v681_v22, %v677_v20  ;;  %v697_v46 = vld [vmem:[#allocation8 + $0x378] sm:$0xff] }
  0xaa   :  { %1194 = vmatprep.subr.bf16.mxu1 %v1193_v41  ;;  %v1149_v35 = vpack.c.bf16 %v647_v33, %v643_v32  ;;  %v644_v41 = vld [vmem:[#allocation8 + $0x1d0] sm:$0xff]  ;;  %v685_v32 = vld [vmem:[#allocation8 + $0x318] sm:$0xff] }
  0xab   :  { %1132 = vmatpush1.bf16.msra.mxu0 %v1131_v42  ;;  %v648_v42 = vld [vmem:[#allocation8 + $0x1f0] sm:$0xff]  ;;  %v1233_v37 = vpack.c.bf16 %v689_v34, %v685_v32  ;;  %v705_v60 = vld [vmem:[#allocation8 + $0x3b8] sm:$0xff] }
  0xac   :  { %1134 = vmatprep.subr.bf16.mxu0 %v1133_v50  ;;  %v1215_v43 = vpack.c.bf16 %v648_v42, %v644_v41  ;;  %v650_v50 = vld [vmem:[#allocation8 + $0x200] sm:$0xff]  ;;  %v691_v42 = vld [vmem:[#allocation8 + $0x348] sm:$0xff]  ;;  %v713_v8 = vld [vmem:[#allocation8 + $0x3f8] sm:$0xff] }
  0xad   :  { %1196 = vmatpush1.bf16.msra.mxu1 %v1195_v45  ;;  %v655_v45 = vld [vmem:[#allocation8 + $0x228] sm:$0xff]  ;;  %v1155_v54 = vpack.c.bf16 %v654_v51, %v650_v50 }
  0xae   :  { %1198 = vmatprep.subr.bf16.mxu1 %v1197_v55  ;;  %v1153_v47 = vpack.c.bf16 %v655_v45, %v651_v44  ;;  %v652_v55 = vld [vmem:[#allocation8 + $0x210] sm:$0xff]  ;;  %v693_v44 = vld [vmem:[#allocation8 + $0x358] sm:$0xff] }
  0xaf   :  { %1136 = vmatpush1.bf16.msra.mxu0 %v1135_v56  ;;  %v656_v56 = vld [vmem:[#allocation8 + $0x230] sm:$0xff]  ;;  %v1237_v50 = vpack.c.bf16 %v697_v46, %v693_v44 }
  0xb0   :  { %1138 = vmatprep.subr.bf16.mxu0 %v1137_v63  ;;  %v1219_v57 = vpack.c.bf16 %v656_v56, %v652_v55  ;;  %v658_v63 = vld [vmem:[#allocation8 + $0x240] sm:$0xff]  ;;  %v699_v56 = vld [vmem:[#allocation8 + $0x388] sm:$0xff] }
  0xb1   :  { %1200 = vmatpush1.bf16.msra.mxu1 %v1199_v59  ;;  %v663_v59 = vld [vmem:[#allocation8 + $0x268] sm:$0xff]  ;;  %v1159_v2 = vpack.c.bf16 %v662_v0, %v658_v63 }
  0xb2   :  { %1202 = vmatprep.subr.bf16.mxu1 %v1201_v3  ;;  %v1157_v61 = vpack.c.bf16 %v663_v59, %v659_v58  ;;  %v660_v3 = vld [vmem:[#allocation8 + $0x250] sm:$0xff]  ;;  %v701_v58 = vld [vmem:[#allocation8 + $0x398] sm:$0xff] }
  0xb3   :  { %1140 = vmatpush1.bf16.msra.mxu0 %v1139_v4  ;;  %v664_v4 = vld [vmem:[#allocation8 + $0x270] sm:$0xff]  ;;  %v1241_v63 = vpack.c.bf16 %v705_v60, %v701_v58 }
  0xb4   :  { %1142 = vmatprep.subr.bf16.mxu0 %v1141_v11  ;;  %v1223_v5 = vpack.c.bf16 %v664_v4, %v660_v3  ;;  %v666_v11 = vld [vmem:[#allocation8 + $0x280] sm:$0xff]  ;;  %v707_v4 = vld [vmem:[#allocation8 + $0x3c8] sm:$0xff] }
  0xb5   :  { %1204 = vmatpush1.bf16.msra.mxu1 %v1203_v7  ;;  %v671_v7 = vld [vmem:[#allocation8 + $0x2a8] sm:$0xff]  ;;  %v1163_v14 = vpack.c.bf16 %v670_v12, %v666_v11 }
  0xb6   :  { %1206 = vmatprep.subr.bf16.mxu1 %v1205_v15  ;;  %v1161_v9 = vpack.c.bf16 %v671_v7, %v667_v6  ;;  %v668_v15 = vld [vmem:[#allocation8 + $0x290] sm:$0xff]  ;;  %v709_v6 = vld [vmem:[#allocation8 + $0x3d8] sm:$0xff] }
  0xb7   :  { %1144 = vmatpush1.bf16.msra.mxu0 %v1143_v16  ;;  %v672_v16 = vld [vmem:[#allocation8 + $0x2b0] sm:$0xff]  ;;  %v1245_v11 = vpack.c.bf16 %v713_v8, %v709_v6 }
  0xb8   :  { %1146 = vmatprep.subr.bf16.mxu0 %v1145_v23  ;;  %v1227_v17 = vpack.c.bf16 %v672_v16, %v668_v15  ;;  %v674_v23 = vld [vmem:[#allocation8 + $0x2c0] sm:$0xff]  ;;  %v398_v16 = vlaneseq }
  0xb9   :  { %1208 = vmatpush1.bf16.msra.mxu1 %v1207_v19  ;;  %v679_v19 = vld [vmem:[#allocation8 + $0x2e8] sm:$0xff]  ;;  %v1167_v26 = vpack.c.bf16 %v678_v24, %v674_v23 }
  0xba   :  { %1210 = vmatprep.subr.bf16.mxu1 %v1209_v27  ;;  %v1165_v21 = vpack.c.bf16 %v679_v19, %v675_v18  ;;  %v676_v27 = vld [vmem:[#allocation8 + $0x2d0] sm:$0xff] }
  0xbb   :  { %1148 = vmatpush1.bf16.msra.mxu0 %v1147_v28  ;;  %v680_v28 = vld [vmem:[#allocation8 + $0x2f0] sm:$0xff] }
  0xbc   :  { %1150 = vmatprep.subr.bf16.mxu0 %v1149_v35  ;;  %v1231_v29 = vpack.c.bf16 %v680_v28, %v676_v27  ;;  %v682_v35 = vld [vmem:[#allocation8 + $0x300] sm:$0xff]  ;;  %v396_v19 = vld [vmem:[%s1470_s5] sm:$0xf] }
  0xbd   :  { %1212 = vmatpush1.bf16.msra.mxu1 %v1211_v31  ;;  %v687_v31 = vld [vmem:[#allocation8 + $0x328] sm:$0xff]  ;;  %v1171_v38 = vpack.c.bf16 %v686_v36, %v682_v35 }
  0xbe   :  { %1214 = vmatprep.subr.bf16.mxu1 %v1213_v39  ;;  %v1169_v33 = vpack.c.bf16 %v687_v31, %v683_v30  ;;  %v684_v39 = vld [vmem:[#allocation8 + $0x310] sm:$0xff] }
  0xbf   :  { %1152 = vmatpush1.bf16.msra.mxu0 %v1151_v40  ;;  %v688_v40 = vld [vmem:[#allocation8 + $0x330] sm:$0xff] }
  0xc0   :  { %1154 = vmatprep.subr.bf16.mxu0 %v1153_v47  ;;  %v1235_v41 = vpack.c.bf16 %v688_v40, %v684_v39  ;;  %v690_v47 = vld [vmem:[#allocation8 + $0x340] sm:$0xff] }
  0xc1   :  { %1216 = vmatpush1.bf16.msra.mxu1 %v1215_v43  ;;  %v695_v43 = vld [vmem:[#allocation8 + $0x368] sm:$0xff]  ;;  %v1175_v51 = vpack.c.bf16 %v694_v48, %v690_v47 }
  0xc2   :  { %1218 = vmatprep.subr.bf16.mxu1 %v1217_v53  ;;  %v1173_v45 = vpack.c.bf16 %v695_v43, %v691_v42  ;;  %v692_v53 = vld [vmem:[#allocation8 + $0x350] sm:$0xff] }
  0xc3   :  { %1156 = vmatpush1.bf16.msra.mxu0 %v1155_v54  ;;  %v696_v54 = vld [vmem:[#allocation8 + $0x370] sm:$0xff] }
  0xc4   :  { %1158 = vmatprep.subr.bf16.mxu0 %v1157_v61  ;;  %v1239_v55 = vpack.c.bf16 %v696_v54, %v692_v53  ;;  %v698_v61 = vld [vmem:[#allocation8 + $0x380] sm:$0xff] }
  0xc5   :  { %1220 = vmatpush1.bf16.msra.mxu1 %v1219_v57  ;;  %v703_v57 = vld [vmem:[#allocation8 + $0x3a8] sm:$0xff]  ;;  %v1179_v0 = vpack.c.bf16 %v702_v62, %v698_v61 }
  0xc6   :  { %1222 = vmatprep.subr.bf16.mxu1 %v1221_v1  ;;  %v1177_v59 = vpack.c.bf16 %v703_v57, %v699_v56  ;;  %v700_v1 = vld [vmem:[#allocation8 + $0x390] sm:$0xff] }
  0xc7   :  { %1160 = vmatpush1.bf16.msra.mxu0 %v1159_v2  ;;  %v704_v2 = vld [vmem:[#allocation8 + $0x3b0] sm:$0xff] }
  0xc8   :  { %1162 = vmatprep.subr.bf16.mxu0 %v1161_v9  ;;  %v1243_v3 = vpack.c.bf16 %v704_v2, %v700_v1  ;;  %v706_v9 = vld [vmem:[#allocation8 + $0x3c0] sm:$0xff] }
  0xc9   :  { %1224 = vmatpush1.bf16.msra.mxu1 %v1223_v5  ;;  %v711_v5 = vld [vmem:[#allocation8 + $0x3e8] sm:$0xff]  ;;  %v1183_v12 = vpack.c.bf16 %v710_v10, %v706_v9 }
  0xca   :  { %1226 = vmatprep.subr.bf16.mxu1 %v1225_v13  ;;  %v1181_v7 = vpack.c.bf16 %v711_v5, %v707_v4  ;;  %v708_v13 = vld [vmem:[#allocation8 + $0x3d0] sm:$0xff] }
  0xcb   :  { %1164 = vmatpush1.bf16.msra.mxu0 %v1163_v14  ;;  %v712_v14 = vld [vmem:[#allocation8 + $0x3f0] sm:$0xff] }
  0xcc   :  { %1166 = vmatprep.subr.bf16.mxu0 %v1165_v21  ;;  %v1247_v15 = vpack.c.bf16 %v712_v14, %v708_v13 }
  0xcd   :  { %1228 = vmatpush1.bf16.msra.mxu1 %v1227_v17  ;;  %v399_v17 = vshrl.u32 %v398_v16, 7 }
  0xce   :  { %1230 = vmatprep.subr.bf16.mxu1 %v1229_v25 }
  0xcf   :  { %1168 = vmatpush1.bf16.msra.mxu0 %v1167_v26  ;;  %v400_v18 = vsub.s32 0, %v399_v17  ;;  %v404_v20 = vsub.s32 1, %v399_v17  ;;  %v408_v34 = vsub.s32 2, %v399_v17 }
  0xd0   :  { %1170 = vmatprep.subr.bf16.mxu0 %v1169_v33  ;;  %v412_v33 = vsub.s32 3, %v399_v17 }
  0xd1   :  { %1232 = vmatpush1.bf16.msra.mxu1 %v1231_v29  ;;  %v401_v21 = vrot.slane %v396_v19, %v400_v18  ;;  %v405_v23 = vrot.slane %v396_v19, %v404_v20 }
  0xd2   :  { %1234 = vmatprep.subr.bf16.mxu1 %v1233_v37  ;;  %v413_v35 = vrot.slane %v396_v19, %v412_v33 }
  0xd3   :  { %1172 = vmatpush1.bf16.msra.mxu0 %v1171_v38  ;;  %v409_v38 = vrot.slane %v396_v19, %v408_v34 }
  0xd4   :  { %1174 = vmatprep.subr.bf16.mxu0 %v1173_v45 }
  0xd5   :  { %1236 = vmatpush1.bf16.msra.mxu1 %v1235_v41 }
  0xd6   :  { %1238 = vmatprep.subr.bf16.mxu1 %v1237_v50 }
  0xd7   :  { %1176 = vmatpush1.bf16.msra.mxu0 %v1175_v51  ;;  %v714_v51 = vld [vmem:[%s1471_s6] sm:$0xf] }
  0xd8   :  { %1178 = vmatprep.subr.bf16.mxu0 %v1177_v59  ;;  %v719_v53 = vrot.slane %v714_v51, %v400_v18  ;;  %v723_v56 = vrot.slane %v714_v51, %v404_v20  ;;  %v731_v1 = vrot.slane %v714_v51, %v412_v33  ;;  %v727_v2 = vrot.slane %v714_v51, %v408_v34 }
  0xd9   :  { %1240 = vmatpush1.bf16.msra.mxu1 %v1239_v55 }
  0xda   :  { %1242 = vmatprep.subr.bf16.mxu1 %v1241_v63 }
  0xdb   :  { %1180 = vmatpush1.bf16.msra.mxu0 %v1179_v0 }
  0xdc   :  { %1182 = vmatprep.subr.bf16.mxu0 %v1181_v7 }
  0xdd   :  { %1244 = vmatpush1.bf16.msra.mxu1 %v1243_v3 }
  0xde   :  { %1246 = vmatprep.subr.bf16.mxu1 %v1245_v11 }
  0xdf   :  { %1184 = vmatpush1.bf16.msra.mxu0 %v1183_v12 }
  0xe1   :  { %1248 = vmatpush1.bf16.msra.mxu1 %v1247_v15 }
 0x175   :  { %v484_v22 = vpop.f32.mrb[0].mxu0 }
 0x176   :  { %v485_v24 = vadd.f32 %v484_v22, %v401_v21  ;;  %v486_v25 = vpop.f32.mrb[1].mxu0 }
 0x177   :  { %v487_v27 = vadd.f32 %v486_v25, %v405_v23  ;;  %v555_v29 = vpop.f32.mrb[0].mxu1 }
 0x178   :  { %v983_v26 = vmul.f32 -1.442695, %v485_v24  ;;  %v557_v30 = vpop.f32.mrb[1].mxu1  ;;  %v556_v41 = vadd.f32 %v555_v29, %v409_v38 }
 0x179   :  { %v984_v28 = vmul.f32 -1.442695, %v487_v27  ;;  %v558_v39 = vadd.f32 %v557_v30, %v413_v35 }
 0x17a   :  { %1255 = vpow2.f32 %v983_v26 }
 0x17b   :  { %1257 = vpow2.f32 %v984_v28 }
 0x184   :  { %v1256_v31 = vpop.eup %1255 }
 0x185   :  { %v563_v32 = vadd.f32 1.0, %v1256_v31  ;;  %v1258_v36 = vpop.eup %1257 }
 0x186   :  { %v569_v37 = vadd.f32 1.0, %v1258_v36 }
 0x187   :  { %1259 = vrcp.f32 %v563_v32 }
 0x188   :  { %1261 = vrcp.f32 %v569_v37 }
 0x191   :  { %v1260_v40 = vpop.eup %1259 }
 0x192   :  { %v572_v42 = vmul.f32 %v1260_v40, %v558_v39  ;;  %v1262_v44 = vpop.eup %1261 }
 0x193   :  { %v575_v45 = vsub.f32 1.0, %v1262_v44  ;;  %v577_v47 = vmul.f32 %v1262_v44, %v1440_v49 }
 0x194   :  { %v573_v43 = vadd.f32 %v572_v42, %v556_v41 }
 0x196   :  { %1263 = vtanh.f32 %v573_v43 }
 0x1a0   :  { %v1264_v46 = vpop.eup %1263 }
 0x1a1   :  { %v576_v48 = vmul.f32 %v1264_v46, %v575_v45 }
 0x1a3   :  { %v578_v50 = vadd.f32 %v577_v47, %v576_v48 }
 0x1a5   :  { %579 = vst [vmem:[%s1472_s7] sm:$0xff] %v578_v50  ;;  %580 = vst [vmem:[#allocation2] sm:$0xff] %v578_v50  ;;  %801 = vmatmul.mubr.f32.vlgmr.msra.gmra.mrb[2].mxu0 %v578_v50  ;;  %872 = vmatmul.mubr.f32.vlgmr.msra.gmra.mrb[2].mxu1 %v578_v50 }
 0x278   :  { %v802_v54 = vpop.f32.mrb[2].mxu0  ;;  %v873_v55 = vpop.f32.mrb[2].mxu1 }
 0x279   :  { %v803_v57 = vadd.f32 %v802_v54, %v719_v53  ;;  %v804_v58 = vpop.f32.mrb[3].mxu0  ;;  %v875_v49 = vpop.f32.mrb[3].mxu1  ;;  %v874_v6 = vadd.f32 %v873_v55, %v727_v2 }
 0x27a   :  { %v805_v60 = vadd.f32 %v804_v58, %v723_v56  ;;  %v876_v4 = vadd.f32 %v875_v49, %v731_v1 }
 0x27b   :  { %v986_v59 = vmul.f32 -1.442695, %v803_v57 }
 0x27c   :  { %v987_v61 = vmul.f32 -1.442695, %v805_v60 }
 0x27d   :  { %1265 = vpow2.f32 %v986_v59 }
 0x27e   :  { %1267 = vpow2.f32 %v987_v61 }
 0x287   :  { %v1266_v62 = vpop.eup %1265 }
 0x288   :  { %v881_v63 = vadd.f32 1.0, %v1266_v62  ;;  %v1268_v0 = vpop.eup %1267 }
 0x289   :  { %v887_v3 = vadd.f32 1.0, %v1268_v0 }
 0x28a   :  { %1269 = vrcp.f32 %v881_v63 }
 0x28b   :  { %1271 = vrcp.f32 %v887_v3 }
 0x294   :  { %v1270_v5 = vpop.eup %1269 }
 0x295   :  { %v890_v7 = vmul.f32 %v1270_v5, %v876_v4  ;;  %v1272_v9 = vpop.eup %1271 }
 0x296   :  { %v893_v10 = vsub.f32 1.0, %v1272_v9  ;;  %v895_v12 = vmul.f32 %v1272_v9, %v1446_v52 }
 0x297   :  { %v891_v8 = vadd.f32 %v890_v7, %v874_v6 }
 0x299   :  { %1273 = vtanh.f32 %v891_v8 }
 0x2a3   :  { %v1274_v11 = vpop.eup %1273 }
 0x2a4   :  { %v894_v13 = vmul.f32 %v1274_v11, %v893_v10 }
 0x2a6   :  { %v896_v14 = vadd.f32 %v895_v12, %v894_v13 }
 0x2a8   :  { %988 = vst [vmem:[%s1472_s7 + $0x8] sm:$0xff] %v896_v14 }
 0x2a9   :  { %903 = vsyncpa [#allocation5], 1 }
 0x2aa   :  { %904 = vsyncpa [#allocation9], 1 }
 0x2ab   :  { %905 = vsyncpa [#allocation6], 1 }
 0x2ac   :  { %906 = vsyncmov [#allocation3] }
 0x2af   :  { %s907_s3 = vpop.sfrf %906 }
 0x2b0   :  { %p989_p5 = scmp.ne.s32.totalorder %s907_s3, 0 }
 0x2b2   :  { %911 = shalt.err (%p989_p5)  }
 0x2b3   :  { %913 = vsyncmov [#allocation3 + $0x1] }
 0x2b6   :  { %s914_s11 = vpop.sfrf %913 }
 0x2b7   :  { %p990_p6 = scmp.ne.s32.totalorder %s914_s11, 0 }
 0x2b9   :  { %918 = shalt.err (%p990_p6)  }
 0x2ba   :  { %920 = vsyncmov [#allocation3 + $0x2] }
 0x2bd   :  { %s921_s12 = vpop.sfrf %920 }
 0x2be   :  { %p991_p7 = scmp.ne.s32.totalorder %s921_s12, 0 }
 0x2c0   :  { %925 = shalt.err (%p991_p7)  }
 0x2c1   :  { %927 = vsyncmov [#allocation3 + $0x3] }
 0x2c4   :  { %s928_s13 = vpop.sfrf %927 }
 0x2c5   :  { %p992_p8 = scmp.ne.s32.totalorder %s928_s13, 0 }
 0x2c7   :  { %932 = shalt.err (%p992_p8)  }

</bundles_post_ra>
